<compile_context>
chip_gen: v5e
topology: v5e:2x2
jax: 0.10.0
libtpu: 0.0.40
codegen_flags: <defaults>
</compile_context>

<pallas_src>
import functools

import jax
import jax.numpy as jnp
from jax import lax
from jax.experimental import pallas as pl
from jax.experimental.pallas import tpu as pltpu


def _vmem_spec():
    # Whole-array resident in VMEM, no grid pipelining (total footprint ~1 MiB).
    return pl.BlockSpec(memory_space=pltpu.MemorySpace.VMEM)


def _softmax_parts(logits):
    """Stable softmax pieces: exp(z - max), row sum, shifted logits (all f32)."""
    z_max = jnp.max(logits, axis=1, keepdims=True)
    z = logits - z_max
    e = jnp.exp(z)                      # padded cols: exp(-1e30 - max) == 0
    s = jnp.sum(e, axis=1, keepdims=True)
    return e, s, z


def vat_fused_kernel(x_ref, eps_ref, w1_ref, b1_ref, w2_ref, b2_ref,
                     p_ref, loss_ref, *, num_classes, radius):
    x = x_ref[...]                          # (B, D)  f32
    eps = eps_ref[...]                      # (B, D)  f32
    # bf16 on the wire (half the dominant HBM bytes), upcast once in VMEM.
    w1 = w1_ref[...].astype(jnp.float32)    # (D, HD)
    w2 = w2_ref[...].astype(jnp.float32)    # (HD, KP); padded cols are zero
    b1 = b1_ref[...]                        # (1, HD) f32
    b2 = b2_ref[...]                        # (1, KP) f32; padded cols = -1e30
    B = x.shape[0]
    Kp = w2.shape[1]

    # ---- _pertub: eps_s = 1e-6 * normalize_perturbation(randn_like(x)) ------
    # normalize_perturbation divides the WHOLE batch by the norm of row 0 only
    # (reproducing the reference `[0]` indexing).
    row0 = eps[0:1, :]
    ss0 = jnp.sum(row0 * row0, axis=1, keepdims=True)              # (1, 1)
    eps_s = eps * (1e-6 * lax.rsqrt(jnp.maximum(ss0, 1e-12)))

    # ---- one stacked MXU pass: clean forward (rows 0..B) + perturbed forward
    xs = jnp.concatenate([x, x + eps_s], axis=0)                   # (2B, D)
    h_all = jnp.maximum(
        jnp.dot(xs, w1, preferred_element_type=jnp.float32) + b1, 0.0)
    logits_all = jnp.dot(h_all, w2, preferred_element_type=jnp.float32) + b2
    p_clean = logits_all[0:B, :]                                   # (B, KP)
    h1 = h_all[B:2 * B, :]                                         # (B, HD)
    logits1 = logits_all[B:2 * B, :]                               # (B, KP)

    # target distribution q = softmax(p.detach()); exact division so the tiny
    # (px - q) gradient signal isn't swamped by approx-reciprocal error.
    e_q, s_q, z_q = _softmax_parts(p_clean)
    q = e_q / s_q
    log_q = z_q - jnp.log(s_q)

    # d/dlogits [ KL(log_softmax(logits1) || q) / B ] = (softmax(logits1)-q)/B
    e_1, s_1, _ = _softmax_parts(logits1)
    px = e_1 / s_1
    g = (px - q) * (1.0 / B)                                       # (B, KP)

    # analytic backward through logits = relu(x@W1+b1)@W2+b2 down to the input.
    # dot_general contracting the LAST dims == g@W2.T / dh@W1.T with no
    # in-kernel transpose (no XLU work, no materialized W.T copy).
    dh = lax.dot_general(g, w2, (((1,), (1,)), ((), ())),
                         preferred_element_type=jnp.float32)       # (B, HD)
    dh = jnp.where(h1 > 0.0, dh, 0.0)
    dx = lax.dot_general(dh, w1, (((1,), (1,)), ((), ())),
                         preferred_element_type=jnp.float32)       # (B, D)

    # eps_adv = normalize_perturbation(eps.grad); x_adv = x + radius * eps_adv
    g0 = dx[0:1, :]
    ssg = jnp.sum(g0 * g0, axis=1, keepdims=True)                  # (1, 1)
    x_adv = x + dx * (radius * lax.rsqrt(jnp.maximum(ssg, 1e-12)))

    # ---- adversarial forward + KL(log_softmax(logits2) || q) / B ------------
    # TODO(synk): reference calls model(..., noise=True, training=True); the
    # synthetic MLP has no noise/dropout path, so those flags are no-ops here.
    h2 = jnp.maximum(
        jnp.dot(x_adv, w1, preferred_element_type=jnp.float32) + b1, 0.0)
    logits2 = jnp.dot(h2, w2, preferred_element_type=jnp.float32) + b2
    _, s_2, z_2 = _softmax_parts(logits2)
    log_p2 = z_2 - jnp.log(s_2)

    valid = lax.broadcasted_iota(jnp.int32, (1, Kp), 1) < num_classes
    kl_rows = jnp.sum(jnp.where(valid, q * (log_q - log_p2), 0.0),
                      axis=1, keepdims=True)                       # (B, 1)
    loss_ref[...] = jnp.sum(kl_rows, axis=0, keepdims=True) * (1.0 / B)
    p_ref[...] = p_clean


def vat_loss(x, eps, params, num_classes, radius=1.0):
    """VATLoss.forward(x, p) with p = model(x) computed inside the same fused
    kernel.  Returns (scalar loss, clean logits p[:, :num_classes])."""
    W1, b1, W2p, b2p = params
    B = x.shape[0]
    D = x.shape[1] * x.shape[2] * x.shape[3]
    Kp = W2p.shape[1]
    x2d = x.reshape(B, D).astype(jnp.float32)

    kernel = functools.partial(vat_fused_kernel,
                               num_classes=int(num_classes),
                               radius=float(radius))
    p_pad, loss = pl.pallas_call(
        kernel,
        in_specs=[_vmem_spec()] * 6,
        out_specs=(_vmem_spec(), _vmem_spec()),
        out_shape=(jax.ShapeDtypeStruct((B, Kp), jnp.float32),
                   jax.ShapeDtypeStruct((1, 1), jnp.float32)),
    )(x2d, eps.astype(jnp.float32), W1, b1, W2p, b2p)
    return loss[0, 0], p_pad[:, :num_classes]


if __name__ == "__main__":
    key = jax.random.PRNGKey(0)
    k_x, k_w1, k_b1, k_w2, k_b2, k_eps = jax.random.split(key, 6)

    B, C, H, W = 2, 4, 16, 16
    D = C * H * W          # 1024
    HD = 128               # hidden units (lane-dense)
    K = 16                 # logical classes
    KP = 128               # class dim padded to a lane-dense 128

    x = jax.random.normal(k_x, (B, C, H, W), dtype=jnp.float32)

    # deterministic synthetic model parameters; weights stored as bf16 (the
    # MXU accepts bf16 on v5e/v6e/v7x; only matmul operands are affected),
    # biases stay f32.
    W1 = (jax.random.normal(k_w1, (D, HD), dtype=jnp.float32)
          / jnp.sqrt(D)).astype(jnp.bfloat16)
    b1 = jax.random.normal(k_b1, (1, HD), dtype=jnp.float32) * 0.01
    W2 = jax.random.normal(k_w2, (HD, K), dtype=jnp.float32) / jnp.sqrt(HD)
    b2 = jax.random.normal(k_b2, (1, K), dtype=jnp.float32) * 0.01

    # zero-pad W2's class dim to 128; bake -1e30 into the padded bias columns
    # so padded logits never survive softmax (no per-softmax masking needed).
    W2p = jnp.zeros((HD, KP), jnp.bfloat16).at[:, :K].set(W2.astype(jnp.bfloat16))
    b2p = jnp.full((1, KP), -1e30, dtype=jnp.float32).at[:, :K].set(b2)
    params = (W1, b1.astype(jnp.float32), W2p, b2p)

    # torch.randn(size=x.size()) — standard normal perturbation seed.
    eps = jax.random.normal(k_eps, (B, D), dtype=jnp.float32)

    loss, p = vat_loss(x, eps, params, num_classes=K, radius=1.0)
    jax.block_until_ready((loss, p))
    assert loss.shape == () and bool(jnp.isfinite(loss))
    assert p.shape == (B, K) and bool(jnp.all(jnp.isfinite(p)))
    print("KERNEL_OK")
</pallas_src>

<mosaic_0001>
module attributes {stable_mosaic.version = 11 : i64} {
  func.func @vat_fused_kernel(%arg0: memref<2x1024xf32, #tpu.memory_space<vmem>>, %arg1: memref<2x1024xf32, #tpu.memory_space<vmem>>, %arg2: memref<1024x128xbf16, #tpu.memory_space<vmem>>, %arg3: memref<1x128xf32, #tpu.memory_space<vmem>>, %arg4: memref<128x128xbf16, #tpu.memory_space<vmem>>, %arg5: memref<1x128xf32, #tpu.memory_space<vmem>>, %arg6: memref<2x128xf32, #tpu.memory_space<vmem>>, %arg7: memref<1x1xf32, #tpu.memory_space<vmem>>) attributes {dimension_semantics = [], scalar_prefetch = 0 : i64, scratch_operands = 0 : i64, tpu.core_type = #tpu.core_type<tc>} {
    %c0 = arith.constant 0 : index
    %c0_0 = arith.constant 0 : index
    %0 = vector.load %arg0[%c0, %c0_0] : memref<2x1024xf32, #tpu.memory_space<vmem>>, vector<2x1024xf32>
    %c0_1 = arith.constant 0 : index
    %c0_2 = arith.constant 0 : index
    %1 = vector.load %arg1[%c0_1, %c0_2] : memref<2x1024xf32, #tpu.memory_space<vmem>>, vector<2x1024xf32>
    %c0_3 = arith.constant 0 : index
    %c0_4 = arith.constant 0 : index
    %2 = vector.load %arg2[%c0_3, %c0_4] : memref<1024x128xbf16, #tpu.memory_space<vmem>>, vector<1024x128xbf16>
    %3 = arith.extf %2 : vector<1024x128xbf16> to vector<1024x128xf32>
    %c0_5 = arith.constant 0 : index
    %c0_6 = arith.constant 0 : index
    %4 = vector.load %arg4[%c0_5, %c0_6] : memref<128x128xbf16, #tpu.memory_space<vmem>>, vector<128x128xbf16>
    %5 = arith.extf %4 : vector<128x128xbf16> to vector<128x128xf32>
    %c0_7 = arith.constant 0 : index
    %c0_8 = arith.constant 0 : index
    %6 = vector.load %arg3[%c0_7, %c0_8] : memref<1x128xf32, #tpu.memory_space<vmem>>, vector<1x128xf32>
    %c0_9 = arith.constant 0 : index
    %c0_10 = arith.constant 0 : index
    %7 = vector.load %arg5[%c0_9, %c0_10] : memref<1x128xf32, #tpu.memory_space<vmem>>, vector<1x128xf32>
    %8 = vector.extract_strided_slice %1 {offsets = [0, 0], sizes = [1, 1024], strides = [1, 1]} : vector<2x1024xf32> to vector<1x1024xf32>
    %9 = arith.mulf %8, %8 : vector<1x1024xf32>
    %cst = arith.constant dense<0.000000e+00> : vector<1xf32>
    %10 = vector.multi_reduction <add>, %9, %cst [1] : vector<1x1024xf32> to vector<1xf32>
    %11 = vector.shape_cast %10 : vector<1xf32> to vector<1x1xf32>
    %cst_11 = arith.constant 9.99999996E-13 : f32
    %12 = vector.broadcast %cst_11 : f32 to vector<1x1xf32>
    %13 = arith.maximumf %11, %12 : vector<1x1xf32>
    %14 = math.rsqrt %13 : vector<1x1xf32>
    %cst_12 = arith.constant 9.99999997E-7 : f32
    %15 = vector.broadcast %cst_12 : f32 to vector<1x1xf32>
    %16 = arith.mulf %15, %14 : vector<1x1xf32>
    %17 = vector.broadcast %16 : vector<1x1xf32> to vector<2x1024xf32>
    %18 = arith.mulf %1, %17 : vector<2x1024xf32>
    %19 = arith.addf %0, %18 : vector<2x1024xf32>
    %20 = tpu.concatenate %0, %19 in 0 : vector<2x1024xf32>, vector<2x1024xf32> -> vector<4x1024xf32>
    %cst_13 = arith.constant dense<0.000000e+00> : vector<4x128xf32>
    %21 = tpu.matmul %20, %3, %cst_13 {dimension_numbers = #tpu.dot_dimension_numbers<[1], [0], [0], [1], [0, 0, 1, 1], [], []>} : vector<4x1024xf32>, vector<1024x128xf32>, vector<4x128xf32> -> vector<4x128xf32>
    %22 = vector.broadcast %6 : vector<1x128xf32> to vector<4x128xf32>
    %23 = arith.addf %21, %22 : vector<4x128xf32>
    %cst_14 = arith.constant 0.000000e+00 : f32
    %24 = vector.broadcast %cst_14 : f32 to vector<4x128xf32>
    %25 = arith.maximumf %23, %24 : vector<4x128xf32>
    %cst_15 = arith.constant dense<0.000000e+00> : vector<4x128xf32>
    %26 = tpu.matmul %25, %5, %cst_15 {dimension_numbers = #tpu.dot_dimension_numbers<[1], [0], [0], [1], [0, 0, 1, 1], [], []>} : vector<4x128xf32>, vector<128x128xf32>, vector<4x128xf32> -> vector<4x128xf32>
    %27 = vector.broadcast %7 : vector<1x128xf32> to vector<4x128xf32>
    %28 = arith.addf %26, %27 : vector<4x128xf32>
    %29 = vector.extract_strided_slice %28 {offsets = [0, 0], sizes = [2, 128], strides = [1, 1]} : vector<4x128xf32> to vector<2x128xf32>
    %30 = vector.extract_strided_slice %25 {offsets = [2, 0], sizes = [2, 128], strides = [1, 1]} : vector<4x128xf32> to vector<2x128xf32>
    %31 = vector.extract_strided_slice %28 {offsets = [2, 0], sizes = [2, 128], strides = [1, 1]} : vector<4x128xf32> to vector<2x128xf32>
    %cst_16 = arith.constant dense<0xFF800000> : vector<2xf32>
    %32 = vector.multi_reduction <maximumf>, %29, %cst_16 [1] : vector<2x128xf32> to vector<2xf32>
    %33 = vector.shape_cast %32 : vector<2xf32> to vector<2x1xf32>
    %34 = vector.broadcast %33 : vector<2x1xf32> to vector<2x128xf32>
    %35 = arith.subf %29, %34 : vector<2x128xf32>
    %36 = math.exp %35 : vector<2x128xf32>
    %cst_17 = arith.constant dense<0.000000e+00> : vector<2xf32>
    %37 = vector.multi_reduction <add>, %36, %cst_17 [1] : vector<2x128xf32> to vector<2xf32>
    %38 = vector.shape_cast %37 : vector<2xf32> to vector<2x1xf32>
    %39 = vector.broadcast %38 : vector<2x1xf32> to vector<2x128xf32>
    %40 = arith.divf %36, %39 : vector<2x128xf32>
    %41 = math.log %38 : vector<2x1xf32>
    %42 = vector.broadcast %41 : vector<2x1xf32> to vector<2x128xf32>
    %43 = arith.subf %35, %42 : vector<2x128xf32>
    %cst_18 = arith.constant dense<0xFF800000> : vector<2xf32>
    %44 = vector.multi_reduction <maximumf>, %31, %cst_18 [1] : vector<2x128xf32> to vector<2xf32>
    %45 = vector.shape_cast %44 : vector<2xf32> to vector<2x1xf32>
    %46 = vector.broadcast %45 : vector<2x1xf32> to vector<2x128xf32>
    %47 = arith.subf %31, %46 : vector<2x128xf32>
    %48 = math.exp %47 : vector<2x128xf32>
    %cst_19 = arith.constant dense<0.000000e+00> : vector<2xf32>
    %49 = vector.multi_reduction <add>, %48, %cst_19 [1] : vector<2x128xf32> to vector<2xf32>
    %50 = vector.shape_cast %49 : vector<2xf32> to vector<2x1xf32>
    %51 = vector.broadcast %50 : vector<2x1xf32> to vector<2x128xf32>
    %52 = arith.divf %48, %51 : vector<2x128xf32>
    %53 = arith.subf %52, %40 : vector<2x128xf32>
    %cst_20 = arith.constant 5.000000e-01 : f32
    %54 = vector.broadcast %cst_20 : f32 to vector<2x128xf32>
    %55 = arith.mulf %53, %54 : vector<2x128xf32>
    %cst_21 = arith.constant dense<0.000000e+00> : vector<2x128xf32>
    %56 = tpu.matmul %55, %5, %cst_21 {dimension_numbers = #tpu.dot_dimension_numbers<[1], [1], [0], [0], [0, 0, 1, 0], [], []>} : vector<2x128xf32>, vector<128x128xf32>, vector<2x128xf32> -> vector<2x128xf32>
    %cst_22 = arith.constant 0.000000e+00 : f32
    %57 = vector.broadcast %cst_22 : f32 to vector<2x128xf32>
    %58 = arith.cmpf ogt, %30, %57 : vector<2x128xf32>
    %cst_23 = arith.constant 0.000000e+00 : f32
    %59 = vector.broadcast %cst_23 : f32 to vector<2x128xf32>
    %60 = arith.select %58, %56, %59 : vector<2x128xi1>, vector<2x128xf32>
    %cst_24 = arith.constant dense<0.000000e+00> : vector<2x1024xf32>
    %61 = tpu.matmul %60, %3, %cst_24 {dimension_numbers = #tpu.dot_dimension_numbers<[1], [1], [0], [0], [0, 0, 1, 0], [], []>} : vector<2x128xf32>, vector<1024x128xf32>, vector<2x1024xf32> -> vector<2x1024xf32>
    %62 = vector.extract_strided_slice %61 {offsets = [0, 0], sizes = [1, 1024], strides = [1, 1]} : vector<2x1024xf32> to vector<1x1024xf32>
    %63 = arith.mulf %62, %62 : vector<1x1024xf32>
    %cst_25 = arith.constant dense<0.000000e+00> : vector<1xf32>
    %64 = vector.multi_reduction <add>, %63, %cst_25 [1] : vector<1x1024xf32> to vector<1xf32>
    %65 = vector.shape_cast %64 : vector<1xf32> to vector<1x1xf32>
    %cst_26 = arith.constant 9.99999996E-13 : f32
    %66 = vector.broadcast %cst_26 : f32 to vector<1x1xf32>
    %67 = arith.maximumf %65, %66 : vector<1x1xf32>
    %68 = math.rsqrt %67 : vector<1x1xf32>
    %cst_27 = arith.constant 1.000000e+00 : f32
    %69 = vector.broadcast %cst_27 : f32 to vector<1x1xf32>
    %70 = arith.mulf %69, %68 : vector<1x1xf32>
    %71 = vector.broadcast %70 : vector<1x1xf32> to vector<2x1024xf32>
    %72 = arith.mulf %61, %71 : vector<2x1024xf32>
    %73 = arith.addf %0, %72 : vector<2x1024xf32>
    %cst_28 = arith.constant dense<0.000000e+00> : vector<2x128xf32>
    %74 = tpu.matmul %73, %3, %cst_28 {dimension_numbers = #tpu.dot_dimension_numbers<[1], [0], [0], [1], [0, 0, 1, 1], [], []>} : vector<2x1024xf32>, vector<1024x128xf32>, vector<2x128xf32> -> vector<2x128xf32>
    %75 = vector.broadcast %6 : vector<1x128xf32> to vector<2x128xf32>
    %76 = arith.addf %74, %75 : vector<2x128xf32>
    %cst_29 = arith.constant 0.000000e+00 : f32
    %77 = vector.broadcast %cst_29 : f32 to vector<2x128xf32>
    %78 = arith.maximumf %76, %77 : vector<2x128xf32>
    %cst_30 = arith.constant dense<0.000000e+00> : vector<2x128xf32>
    %79 = tpu.matmul %78, %5, %cst_30 {dimension_numbers = #tpu.dot_dimension_numbers<[1], [0], [0], [1], [0, 0, 1, 1], [], []>} : vector<2x128xf32>, vector<128x128xf32>, vector<2x128xf32> -> vector<2x128xf32>
    %80 = vector.broadcast %7 : vector<1x128xf32> to vector<2x128xf32>
    %81 = arith.addf %79, %80 : vector<2x128xf32>
    %cst_31 = arith.constant dense<0xFF800000> : vector<2xf32>
    %82 = vector.multi_reduction <maximumf>, %81, %cst_31 [1] : vector<2x128xf32> to vector<2xf32>
    %83 = vector.shape_cast %82 : vector<2xf32> to vector<2x1xf32>
    %84 = vector.broadcast %83 : vector<2x1xf32> to vector<2x128xf32>
    %85 = arith.subf %81, %84 : vector<2x128xf32>
    %86 = math.exp %85 : vector<2x128xf32>
    %cst_32 = arith.constant dense<0.000000e+00> : vector<2xf32>
    %87 = vector.multi_reduction <add>, %86, %cst_32 [1] : vector<2x128xf32> to vector<2xf32>
    %88 = vector.shape_cast %87 : vector<2xf32> to vector<2x1xf32>
    %89 = math.log %88 : vector<2x1xf32>
    %90 = vector.broadcast %89 : vector<2x1xf32> to vector<2x128xf32>
    %91 = arith.subf %85, %90 : vector<2x128xf32>
    %92 = tpu.iota {dimensions = array<i32: 1>} : vector<1x128xi32>
    %c16_i32 = arith.constant 16 : i32
    %93 = vector.broadcast %c16_i32 : i32 to vector<1x128xi32>
    %94 = arith.cmpi slt, %92, %93 : vector<1x128xi32>
    %95 = arith.subf %43, %91 : vector<2x128xf32>
    %96 = arith.mulf %40, %95 : vector<2x128xf32>
    %cst_33 = arith.constant 0.000000e+00 : f32
    %97 = vector.shape_cast %94 : vector<1x128xi1> to vector<1x128xi1>
    %98 = vector.broadcast %97 : vector<1x128xi1> to vector<2x128xi1>
    %99 = vector.broadcast %cst_33 : f32 to vector<2x128xf32>
    %100 = arith.select %98, %96, %99 : vector<2x128xi1>, vector<2x128xf32>
    %cst_34 = arith.constant dense<0.000000e+00> : vector<2xf32>
    %101 = vector.multi_reduction <add>, %100, %cst_34 [1] : vector<2x128xf32> to vector<2xf32>
    %102 = vector.shape_cast %101 : vector<2xf32> to vector<2x1xf32>
    %cst_35 = arith.constant dense<0.000000e+00> : vector<1xf32>
    %103 = vector.multi_reduction <add>, %102, %cst_35 [0] : vector<2x1xf32> to vector<1xf32>
    %104 = vector.shape_cast %103 : vector<1xf32> to vector<1x1xf32>
    %cst_36 = arith.constant 5.000000e-01 : f32
    %105 = vector.broadcast %cst_36 : f32 to vector<1x1xf32>
    %106 = arith.mulf %104, %105 : vector<1x1xf32>
    %c0_37 = arith.constant 0 : index
    %c0_38 = arith.constant 0 : index
    %107 = vector.load %arg7[%c0_37, %c0_38] : memref<1x1xf32, #tpu.memory_space<vmem>>, vector<1x1xf32>
    tpu.vector_store %arg7[%c0_37, %c0_38], %106 {strides = array<i32>} : memref<1x1xf32, #tpu.memory_space<vmem>>, vector<1x1xf32>,
    %c0_39 = arith.constant 0 : index
    %c0_40 = arith.constant 0 : index
    %108 = vector.load %arg6[%c0_39, %c0_40] : memref<2x128xf32, #tpu.memory_space<vmem>>, vector<2x128xf32>
    tpu.vector_store %arg6[%c0_39, %c0_40], %29 {strides = array<i32>} : memref<2x128xf32, #tpu.memory_space<vmem>>, vector<2x128xf32>,
    return
  }
}

</mosaic_0001>

<bundles_post_ra>
// kernel: tpu_custom_call.1
= control target key start
LH: loop header
LB: loop body
LE: loop exit
PB: predicated region body
PF: predicated region fallthrough
CT: control target
= control target key end

     0   :  { %13 = vsyncpa [#allocation3], 0  ;;  %s2700_s0 = inlined_call_operand.hbm [shape: f32[2,1024], index: 0, kind: input, shape index: {}]   ;;  %s2701_s1 = inlined_call_operand.hbm [shape: f32[2,1024], index: 1, kind: input, shape index: {}]   ;;  %s2702_s2 = inlined_call_operand.hbm [shape: bf16[1024,128], index: 2, kind: input, shape index: {}]   ;;  %s2703_s3 = inlined_call_operand.vmem [shape: f32[1,128], index: 3, kind: input, shape index: {}]   ;;  %s2704_s4 = inlined_call_operand.hbm [shape: bf16[128,128], index: 4, kind: input, shape index: {}]   ;;  %s2705_s5 = inlined_call_operand.vmem [shape: f32[1,128], index: 5, kind: input, shape index: {}]   ;;  %s2706_s6 = inlined_call_operand.hbm [shape: f32[2,128], index: 6, kind: output, shape index: {0}]   ;;  %s2707_s7 = inlined_call_operand.hbm [shape: f32[1,1], index: 7, kind: output, shape index: {1}]  }
   0x1   :  { %14 = vsyncpa [#allocation6], 0 }
   0x2   :  { %15 = vsyncpa [#allocation9], 0 }
   0x3   :  { %16 = vsyncpa [#allocation4], 0  ;;  %s34_s26 = sshll.u32 %s2701_s1, 4  ;;  %s35_s26 = int_to_ptr.hbm [resolvable:$true] %s34_s26 }
   0x4   :  { %17 = vsyncpa [#allocation12], 0  ;;  %s1804_s27 = smov [#allocation5]   ;;  %s23_s8 = sshll.u32 %s2700_s0, 4  ;;  %s24_s8 = int_to_ptr.hbm [resolvable:$true] %s23_s8 }
   0x5   :  { %s36_s28 = sshll.u32 %s1804_s27, 4  ;;  %s1805_s9 = smov [#allocation2]   ;;  %s37_s28 = int_to_ptr.vmem [resolvable:$true] %s36_s28 }
   0x6   :  { %39 = dma.hbm_to_vmem [thread:$0]  %s35_s26, 256, %s37_s28, [#allocation6]  }
   0x7   :  { %s25_s10 = sshll.u32 %s1805_s9, 4  ;;  %s44_s13 = sshll.u32 %s2702_s2, 4  ;;  %s26_s10 = int_to_ptr.vmem [resolvable:$true] %s25_s10  ;;  %s45_s13 = int_to_ptr.hbm [resolvable:$true] %s44_s13 }
   0x8   :  { %28 = dma.hbm_to_vmem [thread:$0]  %s24_s8, 256, %s26_s10, [#allocation3]  }
   0x9   :  { %s1806_s1 = smov [#allocation7]   ;;  %s59_s17 = sshll.u32 %s2704_s4, 4  ;;  %s60_s17 = int_to_ptr.hbm [resolvable:$true] %s59_s17 }
   0xa   :  { %s46_s14 = sshll.u32 %s1806_s1, 4  ;;  %s1807_s18 = smov 64   ;;  %s47_s14 = int_to_ptr.vmem [resolvable:$true] %s46_s14 }
   0xb   :  { %s1808_s0 = smov 4   ;;  %s1809_s19 = smov [#allocation8]  }
   0xc   :  { %52 = dma.hbm_to_vmem [thread:$0]  %s45_s13, 8192, %s47_s14, [#allocation6], %s1807_s18, %s1807_s18, %s1808_s0  }
   0xd   :  { %s61_s20 = sshll.u32 %s1809_s19, 4  ;;  %s62_s20 = int_to_ptr.vmem [resolvable:$true] %s61_s20 }
   0xe   :  { %67 = dma.hbm_to_vmem [thread:$0]  %s60_s17, 1024, %s62_s20, [#allocation9], %s1807_s18, %s1807_s18, %s1808_s0  }
   0xf   :  { %1794 = dma.done.wait [#allocation3], 256  }
  0x10   :  { %1795 = vsyncadd [#allocation3], 4294967040 }
  0x11   :  { %1796 = dma.done.wait [#allocation6], 8448  }
  0x12   :  { %1797 = vsyncadd [#allocation6], 4294958848 }
  0x13   :  { %1798 = dma.done.wait [#allocation9], 1024  }
  0x14   :  { %1799 = vsyncadd [#allocation9], 4294966272  ;;  %v1864_v0 = vld [vmem:[#allocation5] sm:$0xff]  ;;  %v1866_v1 = vld [vmem:[#allocation5 + $0x8] sm:$0xff]  ;;  %vm400_vm0 = vcmask 1040384   ;;  %vm478_vm4 = vcmask 1041408  }
  0x15   :  { %v1558_v2 = vld [vmem:[#allocation7 + $0x38] sm:$0xff]   ;;  %v380_v3 = vmul.f32 %v1864_v0, %v1864_v0  ;;  %v1872_v4 = vmul.f32 %v1866_v1, %v1866_v1  ;;  %v1557_v19 = vld [vmem:[#allocation7 + $0x30] sm:$0xff]   ;;  %v1556_v34 = vld [vmem:[#allocation7 + $0x28] sm:$0xff]   ;;  %vm701_vm5 = vcmask 1043458   ;;  %s1236_s23 = sshll.u32 %s2706_s6, 4  ;;  %s1810_s24 = smov [#allocation10]   ;;  %s1237_s23 = int_to_ptr.hbm [resolvable:$true] %s1236_s23 }
  0x16   :  { %v1874_v5 = vunpack.c.h.bf16 %v1558_v2  ;;  %v1566_v6 = vld [vmem:[#allocation7 + $0x78] sm:$0xff]   ;;  %v1876_v9 = vunpack.c.l.bf16 %v1558_v2  ;;  %v1565_v23 = vld [vmem:[#allocation7 + $0x70] sm:$0xff]   ;;  %v1904_v33 = vunpack.c.h.bf16 %v1557_v19  ;;  %v1564_v35 = vld [vmem:[#allocation7 + $0x68] sm:$0xff]   ;;  %v1914_v42 = vunpack.c.l.bf16 %v1557_v19  ;;  %s1234_s25 = sshll.u32 %s1810_s24, 4  ;;  %s1811_s26 = smov [#allocation11]   ;;  %s1235_s25 = int_to_ptr.vmem [resolvable:$true] %s1234_s25 }
  0x17   :  { %v1574_v7 = vld [vmem:[#allocation7 + $0xb8] sm:$0xff]   ;;  %v1878_v10 = vunpack.c.h.bf16 %v1566_v6  ;;  %v1884_v13 = vunpack.c.l.bf16 %v1566_v6  ;;  %v384_v14 = vperm.slane %v380_v3, 0  ;;  %v385_v15 = vperm.slane %v380_v3, 2  ;;  %v1573_v24 = vld [vmem:[#allocation7 + $0xb0] sm:$0xff]   ;;  %v1572_v36 = vld [vmem:[#allocation7 + $0xa8] sm:$0xff]   ;;  %s1245_s27 = sshll.u32 %s1811_s26, 4  ;;  %s1246_s27 = int_to_ptr.vmem [resolvable:$true] %s1245_s27 }
  0x18   :  { %v1582_v8 = vld [vmem:[#allocation7 + $0xf8] sm:$0xff]   ;;  %v1880_v11 = vunpack.c.h.bf16 %v1574_v7  ;;  %v386_v16 = vperm.slane %v380_v3, 4  ;;  %v387_v17 = vperm.slane %v380_v3, 6  ;;  %490 = vmatpush.msra.mxu0 %v1874_v5  ;;  %v388_v18 = vperm.slane %v1872_v4, 0  ;;  %v1581_v25 = vld [vmem:[#allocation7 + $0xf0] sm:$0xff]   ;;  %v1580_v41 = vld [vmem:[#allocation7 + $0xe8] sm:$0xff]  }
  0x19   :  { %v1882_v12 = vunpack.c.h.bf16 %v1582_v8  ;;  %510 = vmatpush.msra.mxu1 %v1878_v10  ;;  %v401_v20 = vsel %vm400_vm0, %v384_v14, 0.0  ;;  %v402_v21 = vsel %vm400_vm0, %v385_v15, 0.0  ;;  %v389_v26 = vperm.slane %v1872_v4, 2  ;;  %v1555_v53 = vld [vmem:[#allocation7 + $0x20] sm:$0xff]   ;;  %s1247_s30 = sshll.u32 %s2707_s7, 4  ;;  %s1248_s30 = int_to_ptr.hbm [resolvable:$true] %s1247_s30 }
  0x1a   :  { %2925 = vst [vmem:[#allocation18_spill] sm:$0xff] %v1880_v11  ;;  %530 = vmatpush.msra.mxu2 %v1880_v11  ;;  %v404_v22 = vsel %vm400_vm0, %v386_v16, 0.0  ;;  %491 = vmatpush.msra.mxu0 %v1876_v9  ;;  %v390_v27 = vperm.slane %v1872_v4, 4  ;;  %v403_v28 = vadd.f32 %v402_v21, %v401_v20  ;;  %v406_v29 = vsel %vm400_vm0, %v387_v17, 0.0  ;;  %v1563_v54 = vld [vmem:[#allocation7 + $0x60] sm:$0xff]   ;;  %v1562_v16 = vld [vmem:[#allocation7 + $0x58] sm:$0xff]  }
  0x1b   :  { %2926 = vst [vmem:[#allocation19_spill] sm:$0xff] %v1882_v12  ;;  %550 = vmatpush.msra.mxu3 %v1882_v12  ;;  %511 = vmatpush.msra.mxu1 %v1884_v13  ;;  %v408_v30 = vsel %vm400_vm0, %v388_v18, 0.0  ;;  %v1900_v31 = vunpack.c.l.bf16 %v1574_v7  ;;  %v1902_v32 = vunpack.c.l.bf16 %v1582_v8  ;;  %v1906_v38 = vunpack.c.h.bf16 %v1565_v23  ;;  %v1571_v58 = vld [vmem:[#allocation7 + $0xa0] sm:$0xff]   ;;  %v1554_v8 = vld [vmem:[#allocation7 + $0x18] sm:$0xff]  }
  0x1c   :  { %v405_v37 = vadd.f32 %v404_v22, %v403_v28  ;;  %v1908_v39 = vunpack.c.h.bf16 %v1573_v24  ;;  %v1910_v40 = vunpack.c.h.bf16 %v1581_v25  ;;  %v1916_v43 = vunpack.c.l.bf16 %v1565_v23  ;;  %492 = vmatpush.msra.mxu0 %v1904_v33  ;;  %v1579_v59 = vld [vmem:[#allocation7 + $0xe0] sm:$0xff]   ;;  %v1570_v17 = vld [vmem:[#allocation7 + $0x98] sm:$0xff]   ;;  %v1996_v28 = vld [vmem:[#allocation2 + $0x8] sm:$0xff] }
  0x1d   :  { %2927 = vst [vmem:[#allocation20_spill] sm:$0xff] %v1900_v31  ;;  %531 = vmatpush.msra.mxu2 %v1900_v31  ;;  %551 = vmatpush.msra.mxu3 %v1902_v32  ;;  %v1918_v44 = vunpack.c.l.bf16 %v1573_v24  ;;  %v1920_v45 = vunpack.c.l.bf16 %v1581_v25  ;;  %v1924_v47 = vunpack.c.h.bf16 %v1556_v34  ;;  %v1926_v48 = vunpack.c.h.bf16 %v1564_v35  ;;  %v1578_v20 = vld [vmem:[#allocation7 + $0xd8] sm:$0xff]   ;;  %v1587_v12 = vld [vmem:[#allocation7 + $0x120] sm:$0xff]  }
  0x1e   :  { %2928 = vst [vmem:[#allocation21_spill] sm:$0xff] %v1902_v32  ;;  %v407_v46 = vadd.f32 %v406_v29, %v405_v37  ;;  %512 = vmatpush.msra.mxu1 %v1906_v38  ;;  %v391_v49 = vperm.slane %v1872_v4, 6  ;;  %v410_v50 = vsel %vm400_vm0, %v389_v26, 0.0  ;;  %v1932_v51 = vunpack.c.h.bf16 %v1572_v36  ;;  %493 = vmatpush.msra.mxu0 %v1914_v42  ;;  %v1561_v37 = vld [vmem:[#allocation7 + $0x50] sm:$0xff]   ;;  %v1604_v32 = vld [vmem:[#allocation7 + $0x1a8] sm:$0xff]   ;;  %v1586_v31 = vld [vmem:[#allocation7 + $0x118] sm:$0xff]  }
  0x1f   :  { %2929 = vst [vmem:[#allocation22_spill] sm:$0xff] %v1908_v39  ;;  %532 = vmatpush.msra.mxu2 %v1908_v39  ;;  %552 = vmatpush.msra.mxu3 %v1910_v40  ;;  %v1934_v52 = vunpack.c.h.bf16 %v1580_v41  ;;  %v1938_v56 = vunpack.c.l.bf16 %v1556_v34  ;;  %v1940_v57 = vunpack.c.l.bf16 %v1564_v35  ;;  %v412_v60 = vsel %vm400_vm0, %v390_v27, 0.0  ;;  %v1994_v27 = vld [vmem:[#allocation2] sm:$0xff]  ;;  %v1594_v11 = vld [vmem:[#allocation7 + $0x158] sm:$0xff]  }
  0x20   :  { %2930 = vst [vmem:[#allocation23_spill] sm:$0xff] %v1910_v40  ;;  %v409_v55 = vadd.f32 %v408_v30, %v407_v46  ;;  %513 = vmatpush.msra.mxu1 %v1916_v43  ;;  %v1945_v61 = vunpack.c.l.bf16 %v1572_v36  ;;  %v1947_v62 = vunpack.c.l.bf16 %v1580_v41  ;;  %494 = vmatpush.msra.mxu0 %v1924_v47  ;;  %v1951_v2 = vunpack.c.h.bf16 %v1555_v53  ;;  %v1553_v36 = vld [vmem:[#allocation7 + $0x10] sm:$0xff]   ;;  %v1588_v40 = vld [vmem:[#allocation7 + $0x128] sm:$0xff]  }
  0x21   :  { %2931 = vst [vmem:[#allocation24_spill] sm:$0xff] %v1918_v44  ;;  %533 = vmatpush.msra.mxu2 %v1918_v44  ;;  %553 = vmatpush.msra.mxu3 %v1920_v45  ;;  %v1953_v3 = vunpack.c.h.bf16 %v1563_v54  ;;  %v414_v4 = vsel %vm400_vm0, %v391_v49, 0.0  ;;  %v1958_v6 = vunpack.c.h.bf16 %v1571_v58  ;;  %v1960_v7 = vunpack.c.h.bf16 %v1579_v59  ;;  %v1569_v41 = vld [vmem:[#allocation7 + $0x90] sm:$0xff]   ;;  %v1603_v44 = vld [vmem:[#allocation7 + $0x1a0] sm:$0xff]  }
  0x22   :  { %2932 = vst [vmem:[#allocation25_spill] sm:$0xff] %v1920_v45  ;;  %v411_v63 = vadd.f32 %v410_v50, %v409_v55  ;;  %514 = vmatpush.msra.mxu1 %v1926_v48  ;;  %495 = vmatpush.msra.mxu0 %v1938_v56  ;;  %v1964_v15 = vunpack.c.l.bf16 %v1555_v53  ;;  %v1968_v18 = vunpack.c.l.bf16 %v1563_v54  ;;  %v1970_v19 = vunpack.c.l.bf16 %v1571_v58  ;;  %v1577_v53 = vld [vmem:[#allocation7 + $0xd0] sm:$0xff]  }
  0x23   :  { %2933 = vst [vmem:[#allocation26_spill] sm:$0xff] %v1932_v51  ;;  %534 = vmatpush.msra.mxu2 %v1932_v51  ;;  %554 = vmatpush.msra.mxu3 %v1934_v52  ;;  %v1974_v22 = vunpack.c.l.bf16 %v1579_v59  ;;  %v1976_v23 = vunpack.c.h.bf16 %v1554_v8  ;;  %v1980_v24 = vunpack.c.h.bf16 %v1562_v16  ;;  %v1982_v25 = vunpack.c.h.bf16 %v1570_v17  ;;  %v1605_v45 = vld [vmem:[#allocation7 + $0x1b0] sm:$0xff]   ;;  %v1595_v51 = vld [vmem:[#allocation7 + $0x160] sm:$0xff]  }
  0x24   :  { %2934 = vst [vmem:[#allocation27_spill] sm:$0xff] %v1934_v52  ;;  %v413_v14 = vadd.f32 %v412_v60, %v411_v63  ;;  %515 = vmatpush.msra.mxu1 %v1940_v57  ;;  %496 = vmatpush.msra.mxu0 %v1951_v2  ;;  %v1985_v26 = vunpack.c.h.bf16 %v1578_v20  ;;  %v1998_v29 = vunpack.c.l.bf16 %v1554_v8  ;;  %v2000_v30 = vunpack.c.l.bf16 %v1562_v16  ;;  %v1552_v63 = vld [vmem:[#allocation7 + $0x8] sm:$0xff]   ;;  %v1589_v52 = vld [vmem:[#allocation7 + $0x130] sm:$0xff]  }
  0x25   :  { %2935 = vst [vmem:[#allocation28_spill] sm:$0xff] %v1945_v61  ;;  %535 = vmatpush.msra.mxu2 %v1945_v61  ;;  %555 = vmatpush.msra.mxu3 %v1947_v62  ;;  %v2002_v34 = vunpack.c.l.bf16 %v1570_v17  ;;  %v2004_v35 = vunpack.c.l.bf16 %v1578_v20  ;;  %v2010_v46 = vunpack.c.h.bf16 %v1553_v36  ;;  %v2012_v49 = vunpack.c.h.bf16 %v1561_v37  ;;  %v1568_v8 = vld [vmem:[#allocation7 + $0x88] sm:$0xff]  }
  0x26   :  { %2936 = vst [vmem:[#allocation29_spill] sm:$0xff] %v1947_v62  ;;  %v415_v21 = vadd.f32 %v414_v4, %v413_v14  ;;  %516 = vmatpush.msra.mxu1 %v1953_v3  ;;  %497 = vmatpush.msra.mxu0 %v1964_v15  ;;  %v2014_v50 = vunpack.c.h.bf16 %v1569_v41  ;;  %v2018_v54 = vunpack.c.h.bf16 %v1577_v53  ;;  %v2022_v55 = vunpack.c.l.bf16 %v1553_v36  ;;  %v1560_v4 = vld [vmem:[#allocation7 + $0x48] sm:$0xff]   ;;  %v1606_v62 = vld [vmem:[#allocation7 + $0x1b8] sm:$0xff]  }
  0x27   :  { %2937 = vst [vmem:[#allocation30_spill] sm:$0xff] %v1958_v6  ;;  %536 = vmatpush.msra.mxu2 %v1958_v6  ;;  %556 = vmatpush.msra.mxu3 %v1960_v7  ;;  %v2024_v58 = vunpack.c.l.bf16 %v1561_v37  ;;  %v2026_v59 = vunpack.c.l.bf16 %v1569_v41  ;;  %v2028_v60 = vunpack.c.l.bf16 %v1577_v53  ;;  %v2034_v14 = vunpack.c.h.bf16 %v1552_v63  ;;  %v1576_v20 = vld [vmem:[#allocation7 + $0xc8] sm:$0xff]  }
  0x28   :  { %2938 = vst [vmem:[#allocation31_spill] sm:$0xff] %v1960_v7  ;;  %416 = vadd.xlane.f32.xlu0 %v415_v21  ;;  %517 = vmatpush.msra.mxu1 %v1968_v18  ;;  %v2036_v16 = vunpack.c.h.bf16 %v1560_v4  ;;  %v2038_v17 = vunpack.c.h.bf16 %v1568_v8  ;;  %v2042_v21 = vunpack.c.h.bf16 %v1576_v20  ;;  %v2046_v36 = vunpack.c.l.bf16 %v1552_v63  ;;  %v1590_v7 = vld [vmem:[#allocation7 + $0x138] sm:$0xff]   ;;  %v1596_v6 = vld [vmem:[#allocation7 + $0x168] sm:$0xff]  }
  0x29   :  { %2939 = vst [vmem:[#allocation32_spill] sm:$0xff] %v1970_v19  ;;  %537 = vmatpush.msra.mxu2 %v1970_v19  ;;  %557 = vmatpush.msra.mxu3 %v1974_v22  ;;  %v2048_v37 = vunpack.c.l.bf16 %v1560_v4  ;;  %v2050_v41 = vunpack.c.l.bf16 %v1568_v8  ;;  %v2052_v53 = vunpack.c.l.bf16 %v1576_v20  ;;  %v1575_v8 = vld [vmem:[#allocation7 + $0xc0] sm:$0xff]  }
  0x2a   :  { %2940 = vst [vmem:[#allocation33_spill] sm:$0xff] %v1974_v22  ;;  %498 = vmatpush.msra.mxu0 %v1976_v23  ;;  %518 = vmatpush.msra.mxu1 %v1980_v24  ;;  %v2066_v20 = vunpack.c.h.bf16 %v1575_v8 }
  0x2b   :  { %2941 = vst [vmem:[#allocation34_spill] sm:$0xff] %v1982_v25  ;;  %538 = vmatpush.msra.mxu2 %v1982_v25  ;;  %558 = vmatpush.msra.mxu3 %v1985_v26  ;;  %v1597_v25 = vld [vmem:[#allocation7 + $0x170] sm:$0xff]  }
  0x2c   :  { %2942 = vst [vmem:[#allocation35_spill] sm:$0xff] %v1985_v26  ;;  %499 = vmatpush.msra.mxu0 %v1998_v29  ;;  %519 = vmatpush.msra.mxu1 %v2000_v30 }
  0x2d   :  { %2943 = vst [vmem:[#allocation36_spill] sm:$0xff] %v1994_v27  ;;  %539 = vmatpush.msra.mxu2 %v2002_v34  ;;  %559 = vmatpush.msra.mxu3 %v2004_v35 }
  0x2e   :  { %2944 = vst [vmem:[#allocation37_spill] sm:$0xff] %v1996_v28  ;;  %500 = vmatpush.msra.mxu0 %v2010_v46  ;;  %520 = vmatpush.msra.mxu1 %v2012_v49 }
  0x2f   :  { %2945 = vst [vmem:[#allocation38_spill] sm:$0xff] %v2002_v34  ;;  %540 = vmatpush.msra.mxu2 %v2014_v50  ;;  %560 = vmatpush.msra.mxu3 %v2018_v54  ;;  %v2084_v34 = vunpack.c.h.bf16 %v1606_v62 }
  0x30   :  { %2946 = vst [vmem:[#allocation39_spill] sm:$0xff] %v2004_v35  ;;  %501 = vmatpush.msra.mxu0 %v2022_v55  ;;  %521 = vmatpush.msra.mxu1 %v2024_v58  ;;  %v1567_v35 = vld [vmem:[#allocation7 + $0x80] sm:$0xff]  }
  0x31   :  { %437 = vst [vmem:[#allocation1] ss:$4 sm:$0xff] %v1994_v27  ;;  %541 = vmatpush.msra.mxu2 %v2026_v59  ;;  %561 = vmatpush.msra.mxu3 %v2028_v60  ;;  %v2062_v4 = vunpack.c.h.bf16 %v1567_v35  ;;  %v2074_v22 = vunpack.c.l.bf16 %v1567_v35 }
  0x32   :  { %439 = vst [vmem:[#allocation1 + $0x20] ss:$4 sm:$0xff] %v1996_v28  ;;  %502 = vmatpush.msra.mxu0 %v2034_v14  ;;  %522 = vmatpush.msra.mxu1 %v2036_v16 }
  0x33   :  { %2947 = vst [vmem:[#allocation40_spill] sm:$0xff] %v2010_v46  ;;  %542 = vmatpush.msra.mxu2 %v2038_v17  ;;  %562 = vmatpush.msra.mxu3 %v2042_v21 }
  0x34   :  { %2948 = vst [vmem:[#allocation41_spill] sm:$0xff] %v2012_v49  ;;  %503 = vmatpush.msra.mxu0 %v2046_v36  ;;  %523 = vmatpush.msra.mxu1 %v2048_v37 }
  0x35   :  { %2949 = vst [vmem:[#allocation42_spill] sm:$0xff] %v2014_v50  ;;  %543 = vmatpush.msra.mxu2 %v2050_v41  ;;  %563 = vmatpush.msra.mxu3 %v2052_v53  ;;  %v1598_v50 = vld [vmem:[#allocation7 + $0x178] sm:$0xff]  }
  0x36   :  { %2950 = vst [vmem:[#allocation43_spill] sm:$0xff] %v2018_v54  ;;  %v1265_v54 = vld [vmem:[#allocation7] sm:$0xff]  }
  0x37   :  { %2951 = vst [vmem:[#allocation44_spill] sm:$0xff] %v2022_v55  ;;  %v2058_v26 = vunpack.c.h.bf16 %v1265_v54  ;;  %544 = vmatpush.msra.mxu2 %v2062_v4  ;;  %564 = vmatpush.msra.mxu3 %v2066_v20 }
  0x38   :  { %2952 = vst [vmem:[#allocation45_spill] sm:$0xff] %v2024_v58 }
  0x39   :  { %2953 = vst [vmem:[#allocation46_spill] sm:$0xff] %v2026_v59  ;;  %504 = vmatpush.msra.mxu0 %v2058_v26  ;;  %v2076_v59 = vunpack.c.l.bf16 %v1575_v8  ;;  %545 = vmatpush.msra.mxu2 %v2074_v22  ;;  %v2094_v8 = vunpack.c.l.bf16 %v1598_v50 }
  0x3a   :  { %2954 = vst [vmem:[#allocation47_spill] sm:$0xff] %v2028_v60  ;;  %v1559_v60 = vld [vmem:[#allocation7 + $0x40] sm:$0xff]  }
  0x3b   :  { %2955 = vst [vmem:[#allocation48_spill] sm:$0xff] %v2034_v14  ;;  %v2060_v63 = vunpack.c.h.bf16 %v1559_v60  ;;  %565 = vmatpush.msra.mxu3 %v2076_v59  ;;  %610 = vmatpush.msrb.mxu2 %v2084_v34 }
  0x3c   :  { %2956 = vst [vmem:[#allocation49_spill] sm:$0xff] %v2036_v16 }
  0x3d   :  { %2957 = vst [vmem:[#allocation50_spill] sm:$0xff] %v2038_v17  ;;  %524 = vmatpush.msra.mxu1 %v2060_v63  ;;  %v2072_v17 = vunpack.c.l.bf16 %v1559_v60  ;;  %v2092_v60 = vunpack.c.l.bf16 %v1590_v7 }
  0x3e   :  { %2958 = vst [vmem:[#allocation51_spill] sm:$0xff] %v2042_v21  ;;  %v2070_v21 = vunpack.c.l.bf16 %v1265_v54  ;;  %v1614_v54 = vld [vmem:[#allocation7 + $0x1f8] sm:$0xff]  }
  0x3f   :  { %2959 = vst [vmem:[#allocation52_spill] sm:$0xff] %v2046_v36  ;;  %525 = vmatpush.msra.mxu1 %v2072_v17  ;;  %v2088_v35 = vunpack.c.h.bf16 %v1614_v54 }
  0x40   :  { %2960 = vst [vmem:[#allocation53_spill] sm:$0xff] %v2048_v37  ;;  %505 = vmatpush.msra.mxu0 %v2070_v21 }
  0x41   :  { %2961 = vst [vmem:[#allocation54_spill] sm:$0xff] %v2050_v41  ;;  %v2082_v41 = vunpack.c.h.bf16 %v1598_v50  ;;  %630 = vmatpush.msrb.mxu3 %v2088_v35  ;;  %v2108_v50 = vunpack.c.h.bf16 %v1605_v45 }
  0x42   :  { %2962 = vst [vmem:[#allocation55_spill] sm:$0xff] %v2052_v53  ;;  %v2080_v53 = vunpack.c.h.bf16 %v1590_v7  ;;  %v2106_v7 = vunpack.c.h.bf16 %v1597_v25 }
  0x43   :  { %2963 = vst [vmem:[#allocation56_spill] sm:$0xff] %v2058_v26  ;;  %590 = vmatpush.msrb.mxu1 %v2082_v41 }
  0x44   :  { %2964 = vst [vmem:[#allocation57_spill] sm:$0xff] %v2060_v63  ;;  %570 = vmatpush.msrb.mxu0 %v2080_v53 }
  0x45   :  { %2965 = vst [vmem:[#allocation58_spill] sm:$0xff] %v2062_v4  ;;  %v2098_v4 = vunpack.c.l.bf16 %v1614_v54  ;;  %591 = vmatpush.msrb.mxu1 %v2094_v8 }
  0x46   :  { %2966 = vst [vmem:[#allocation59_spill] sm:$0xff] %v2066_v20  ;;  %v2096_v20 = vunpack.c.l.bf16 %v1606_v62  ;;  %v1613_v62 = vld [vmem:[#allocation7 + $0x1f0] sm:$0xff]   ;;  %571 = vmatpush.msrb.mxu0 %v2092_v60 }
  0x47   :  { %2967 = vst [vmem:[#allocation60_spill] sm:$0xff] %v2070_v21  ;;  %v2112_v54 = vunpack.c.h.bf16 %v1613_v62  ;;  %631 = vmatpush.msrb.mxu3 %v2098_v4  ;;  %v2122_v19 = vunpack.c.l.bf16 %v1613_v62  ;;  %592 = vmatpush.msrb.mxu1 %v2106_v7 }
  0x48   :  { %2968 = vst [vmem:[#allocation61_spill] sm:$0xff] %v2072_v17  ;;  %611 = vmatpush.msrb.mxu2 %v2096_v20 }
  0x49   :  { %2969 = vst [vmem:[#allocation62_spill] sm:$0xff] %v2074_v22  ;;  %v2120_v22 = vunpack.c.l.bf16 %v1605_v45  ;;  %632 = vmatpush.msrb.mxu3 %v2112_v54  ;;  %v1612_v45 = vld [vmem:[#allocation7 + $0x1e8] sm:$0xff]  }
  0x4a   :  { %2970 = vst [vmem:[#allocation63_spill] sm:$0xff] %v2076_v59  ;;  %v2104_v59 = vunpack.c.h.bf16 %v1589_v52  ;;  %612 = vmatpush.msrb.mxu2 %v2108_v50  ;;  %v2136_v62 = vunpack.c.h.bf16 %v1612_v45  ;;  %v2146_v61 = vunpack.c.l.bf16 %v1612_v45 }
  0x4b   :  { %2971 = vst [vmem:[#allocation64_spill] sm:$0xff] %v2080_v53  ;;  %633 = vmatpush.msrb.mxu3 %v2122_v19 }
  0x4c   :  { %2972 = vst [vmem:[#allocation65_spill] sm:$0xff] %v2082_v41  ;;  %572 = vmatpush.msrb.mxu0 %v2104_v59  ;;  %613 = vmatpush.msrb.mxu2 %v2120_v22 }
  0x4d   :  { %2973 = vst [vmem:[#allocation66_spill] sm:$0xff] %v2084_v34  ;;  %v2116_v34 = vunpack.c.l.bf16 %v1589_v52  ;;  %v2130_v52 = vunpack.c.h.bf16 %v1596_v6  ;;  %634 = vmatpush.msrb.mxu3 %v2136_v62 }
  0x4e   :  { %2974 = vst [vmem:[#allocation67_spill] sm:$0xff] %v2088_v35  ;;  %v2118_v35 = vunpack.c.l.bf16 %v1597_v25  ;;  %v2132_v25 = vunpack.c.h.bf16 %v1604_v32 }
  0x4f   :  { %2975 = vst [vmem:[#allocation68_spill] sm:$0xff] %v2092_v60  ;;  %573 = vmatpush.msrb.mxu0 %v2116_v34  ;;  %635 = vmatpush.msrb.mxu3 %v2146_v61 }
  0x50   :  { %2976 = vst [vmem:[#allocation69_spill] sm:$0xff] %v2094_v8  ;;  %593 = vmatpush.msrb.mxu1 %v2118_v35  ;;  %614 = vmatpush.msrb.mxu2 %v2132_v25 }
  0x51   :  { %2977 = vst [vmem:[#allocation70_spill] sm:$0xff] %v2096_v20  ;;  %v2144_v20 = vunpack.c.l.bf16 %v1604_v32  ;;  %v1611_v32 = vld [vmem:[#allocation7 + $0x1e0] sm:$0xff]  }
  0x52   :  { %2978 = vst [vmem:[#allocation71_spill] sm:$0xff] %v2098_v4  ;;  %v2128_v4 = vunpack.c.h.bf16 %v1588_v40  ;;  %594 = vmatpush.msrb.mxu1 %v2130_v52  ;;  %v2160_v45 = vunpack.c.h.bf16 %v1611_v32  ;;  %v2170_v39 = vunpack.c.l.bf16 %v1611_v32  ;;  %v1593_v32 = vld [vmem:[#allocation7 + $0x150] sm:$0xff]  }
  0x53   :  { %2979 = vst [vmem:[#allocation72_spill] sm:$0xff] %v2104_v59  ;;  %615 = vmatpush.msrb.mxu2 %v2144_v20 }
  0x54   :  { %2980 = vst [vmem:[#allocation73_spill] sm:$0xff] %v2106_v7  ;;  %574 = vmatpush.msrb.mxu0 %v2128_v4  ;;  %636 = vmatpush.msrb.mxu3 %v2160_v45 }
  0x55   :  { %2981 = vst [vmem:[#allocation74_spill] sm:$0xff] %v2108_v50  ;;  %v2140_v50 = vunpack.c.l.bf16 %v1588_v40  ;;  %v2154_v40 = vunpack.c.h.bf16 %v1595_v51 }
  0x56   :  { %2982 = vst [vmem:[#allocation75_spill] sm:$0xff] %v2112_v54  ;;  %v2142_v54 = vunpack.c.l.bf16 %v1596_v6  ;;  %v2156_v6 = vunpack.c.h.bf16 %v1603_v44  ;;  %637 = vmatpush.msrb.mxu3 %v2170_v39 }
  0x57   :  { %2983 = vst [vmem:[#allocation76_spill] sm:$0xff] %v2116_v34  ;;  %575 = vmatpush.msrb.mxu0 %v2140_v50 }
  0x58   :  { %2984 = vst [vmem:[#allocation77_spill] sm:$0xff] %v2118_v35  ;;  %595 = vmatpush.msrb.mxu1 %v2142_v54  ;;  %616 = vmatpush.msrb.mxu2 %v2156_v6 }
  0x59   :  { %2985 = vst [vmem:[#allocation78_spill] sm:$0xff] %v2120_v22  ;;  %v2168_v22 = vunpack.c.l.bf16 %v1603_v44 }
  0x5a   :  { %2986 = vst [vmem:[#allocation79_spill] sm:$0xff] %v2122_v19  ;;  %v2152_v19 = vunpack.c.h.bf16 %v1587_v12  ;;  %596 = vmatpush.msrb.mxu1 %v2154_v40 }
  0x5b   :  { %2987 = vst [vmem:[#allocation80_spill] sm:$0xff] %v2128_v4  ;;  %v1609_v4 = vld [vmem:[#allocation7 + $0x1d0] sm:$0xff]   ;;  %617 = vmatpush.msrb.mxu2 %v2168_v22 }
  0x5c   :  { %2988 = vst [vmem:[#allocation81_spill] sm:$0xff] %v2130_v52  ;;  %v1602_v52 = vld [vmem:[#allocation7 + $0x198] sm:$0xff]   ;;  %576 = vmatpush.msrb.mxu0 %v2152_v19 }
  0x5d   :  { %2989 = vst [vmem:[#allocation82_spill] sm:$0xff] %v2132_v25  ;;  %v2164_v25 = vunpack.c.l.bf16 %v1587_v12  ;;  %v2180_v12 = vunpack.c.h.bf16 %v1602_v52 }
  0x5e   :  { %2990 = vst [vmem:[#allocation83_spill] sm:$0xff] %v2136_v62  ;;  %v2166_v62 = vunpack.c.l.bf16 %v1595_v51  ;;  %v1585_v51 = vld [vmem:[#allocation7 + $0x110] sm:$0xff]  }
  0x5f   :  { %2991 = vst [vmem:[#allocation84_spill] sm:$0xff] %v2140_v50  ;;  %577 = vmatpush.msrb.mxu0 %v2164_v25  ;;  %v1601_v50 = vld [vmem:[#allocation7 + $0x190] sm:$0xff]   ;;  %618 = vmatpush.msrb.mxu2 %v2180_v12 }
  0x60   :  { %2992 = vst [vmem:[#allocation85_spill] sm:$0xff] %v2142_v54  ;;  %v2174_v54 = vunpack.c.h.bf16 %v1586_v31  ;;  %597 = vmatpush.msrb.mxu1 %v2166_v62 }
  0x61   :  { %2993 = vst [vmem:[#allocation86_spill] sm:$0xff] %v2144_v20  ;;  %v2176_v20 = vunpack.c.h.bf16 %v1594_v11 }
  0x62   :  { %2994 = vst [vmem:[#allocation87_spill] sm:$0xff] %v2146_v61  ;;  %v1610_v61 = vld [vmem:[#allocation7 + $0x1d8] sm:$0xff]   ;;  %578 = vmatpush.msrb.mxu0 %v2174_v54 }
  0x63   :  { %2995 = vst [vmem:[#allocation88_spill] sm:$0xff] %v2152_v19  ;;  %v2182_v44 = vunpack.c.h.bf16 %v1610_v61  ;;  %v2188_v19 = vunpack.c.l.bf16 %v1594_v11  ;;  %598 = vmatpush.msrb.mxu1 %v2176_v20 }
  0x64   :  { %2996 = vst [vmem:[#allocation89_spill] sm:$0xff] %v2154_v40  ;;  %v2186_v40 = vunpack.c.l.bf16 %v1586_v31  ;;  %v2200_v31 = vunpack.c.h.bf16 %v1593_v32 }
  0x65   :  { %2997 = vst [vmem:[#allocation90_spill] sm:$0xff] %v2156_v6  ;;  %v2194_v6 = vunpack.c.l.bf16 %v1610_v61  ;;  %638 = vmatpush.msrb.mxu3 %v2182_v44  ;;  %599 = vmatpush.msrb.mxu1 %v2188_v19  ;;  %v2212_v61 = vunpack.c.l.bf16 %v1585_v51 }
  0x66   :  { %2998 = vst [vmem:[#allocation91_spill] sm:$0xff] %v2160_v45  ;;  %v2192_v45 = vunpack.c.l.bf16 %v1602_v52  ;;  %v2208_v52 = vunpack.c.h.bf16 %v1609_v4  ;;  %579 = vmatpush.msrb.mxu0 %v2186_v40 }
  0x67   :  { %2999 = vst [vmem:[#allocation92_spill] sm:$0xff] %v2164_v25  ;;  %639 = vmatpush.msrb.mxu3 %v2194_v6  ;;  %600 = vmatpush.msrb.mxu1 %v2200_v31 }
  0x68   :  { %3000 = vst [vmem:[#allocation93_spill] sm:$0xff] %v2166_v62  ;;  %v2198_v62 = vunpack.c.h.bf16 %v1585_v51  ;;  %619 = vmatpush.msrb.mxu2 %v2192_v45  ;;  %v1584_v51 = vld [vmem:[#allocation7 + $0x108] sm:$0xff]  }
  0x69   :  { %3001 = vst [vmem:[#allocation94_spill] sm:$0xff] %v2168_v22  ;;  %v2214_v22 = vunpack.c.l.bf16 %v1593_v32  ;;  %640 = vmatpush.msrb.mxu3 %v2208_v52  ;;  %v1592_v32 = vld [vmem:[#allocation7 + $0x148] sm:$0xff]  }
  0x6a   :  { %3002 = vst [vmem:[#allocation95_spill] sm:$0xff] %v2170_v39  ;;  %v2206_v39 = vunpack.c.h.bf16 %v1601_v50  ;;  %580 = vmatpush.msrb.mxu0 %v2198_v62 }
  0x6b   :  { %3003 = vst [vmem:[#allocation96_spill] sm:$0xff] %v2174_v54  ;;  %601 = vmatpush.msrb.mxu1 %v2214_v22 }
  0x6c   :  { %3004 = vst [vmem:[#allocation97_spill] sm:$0xff] %v2176_v20  ;;  %620 = vmatpush.msrb.mxu2 %v2206_v39  ;;  %581 = vmatpush.msrb.mxu0 %v2212_v61  ;;  %v1607_v20 = vld [vmem:[#allocation7 + $0x1c0] sm:$0xff]  }
  0x6d   :  { %3005 = vst [vmem:[#allocation98_spill] sm:$0xff] %v2180_v12  ;;  %v1600_v12 = vld [vmem:[#allocation7 + $0x188] sm:$0xff]  }
  0x6e   :  { %3006 = vst [vmem:[#allocation99_spill] sm:$0xff] %v2182_v44  ;;  %v2221_v44 = vunpack.c.l.bf16 %v1609_v4  ;;  %v2233_v4 = vunpack.c.h.bf16 %v1600_v12 }
  0x6f   :  { %3007 = vst [vmem:[#allocation100_spill] sm:$0xff] %v2186_v40 }
  0x70   :  { %3008 = vst [vmem:[#allocation101_spill] sm:$0xff] %v2188_v19  ;;  %641 = vmatpush.msrb.mxu3 %v2221_v44  ;;  %v1599_v19 = vld [vmem:[#allocation7 + $0x180] sm:$0xff]  }
  0x71   :  { %3009 = vst [vmem:[#allocation102_spill] sm:$0xff] %v2192_v45  ;;  %v1608_v45 = vld [vmem:[#allocation7 + $0x1c8] sm:$0xff]  }
  0x72   :  { %3010 = vst [vmem:[#allocation103_spill] sm:$0xff] %v2194_v6  ;;  %v2229_v6 = vunpack.c.h.bf16 %v1584_v51  ;;  %v2247_v40 = vunpack.c.l.bf16 %v1608_v45 }
  0x73   :  { %3011 = vst [vmem:[#allocation104_spill] sm:$0xff] %v2198_v62  ;;  %v1591_v62 = vld [vmem:[#allocation7 + $0x140] sm:$0xff]  }
  0x74   :  { %3012 = vst [vmem:[#allocation105_spill] sm:$0xff] %v2200_v31  ;;  %v2241_v31 = vunpack.c.l.bf16 %v1592_v32  ;;  %582 = vmatpush.msrb.mxu0 %v2229_v6 }
  0x75   :  { %3013 = vst [vmem:[#allocation106_spill] sm:$0xff] %v2206_v39  ;;  %v2237_v39 = vunpack.c.h.bf16 %v1608_v45 }
  0x76   :  { %3014 = vst [vmem:[#allocation107_spill] sm:$0xff] %v2208_v52  ;;  %v2239_v52 = vunpack.c.l.bf16 %v1584_v51 }
  0x77   :  { %3015 = vst [vmem:[#allocation108_spill] sm:$0xff] %v2212_v61  ;;  %v2243_v61 = vunpack.c.l.bf16 %v1600_v12  ;;  %642 = vmatpush.msrb.mxu3 %v2237_v39  ;;  %v2255_v12 = vunpack.c.h.bf16 %v1599_v19 }
  0x78   :  { %3016 = vst [vmem:[#allocation109_spill] sm:$0xff] %v2214_v22  ;;  %v1583_v22 = vld [vmem:[#allocation7 + $0x100] sm:$0xff]   ;;  %583 = vmatpush.msrb.mxu0 %v2239_v52 }
  0x79   :  { %3018 = vst [vmem:[#allocation111_spill] sm:$0xff] %v2221_v44  ;;  %v2251_v44 = vunpack.c.h.bf16 %v1591_v62  ;;  %v2262_v45 = vunpack.c.l.bf16 %v1583_v22  ;;  %643 = vmatpush.msrb.mxu3 %v2247_v40 }
  0x7a   :  { %3019 = vst [vmem:[#allocation112_spill] sm:$0xff] %v2229_v6 }
  0x7b   :  { %3021 = vst [vmem:[#allocation114_spill] sm:$0xff] %v2233_v4 }
  0x7c   :  { %3022 = vst [vmem:[#allocation115_spill] sm:$0xff] %v2237_v39  ;;  %v2270_v39 = vunpack.c.l.bf16 %v1607_v20 }
  0x7d   :  { %3023 = vst [vmem:[#allocation116_spill] sm:$0xff] %v2239_v52 }
  0x7e   :  { %3024 = vst [vmem:[#allocation117_spill] sm:$0xff] %v2241_v31 }
  0x7f   :  { %3025 = vst [vmem:[#allocation118_spill] sm:$0xff] %v2243_v61 }
  0x80   :  { %3026 = vst [vmem:[#allocation119_spill] sm:$0xff] %v2247_v40 }
  0x81   :  { %3028 = vst [vmem:[#allocation121_spill] sm:$0xff] %v2251_v44 }
  0x82   :  { %3029 = vst [vmem:[#allocation122_spill] sm:$0xff] %v2255_v12 }
  0x83   :  { %3031 = vst [vmem:[#allocation124_spill] sm:$0xff] %v2262_v45 }
  0x84   :  { %3034 = vst [vmem:[#allocation127_spill] sm:$0xff] %v2270_v39 }
  0x9b   :  { %v417_v35 = vpop.xlane.xlu0 %416 }
  0x9c   :  { %v2202_v11 = vmax.f32 %v417_v35, 1e-12  ;;  %v2219_v35 = vunpack.c.l.bf16 %v1601_v50  ;;  %v2231_v50 = vunpack.c.h.bf16 %v1592_v32  ;;  %v2257_v32 = vunpack.c.h.bf16 %v1607_v20 }
  0x9e   :  { %1632 = vrsqrt.f32 %v2202_v11  ;;  %3017 = vst [vmem:[#allocation110_spill] sm:$0xff] %v2219_v35  ;;  %621 = vmatpush.msrb.mxu2 %v2219_v35  ;;  %602 = vmatpush.msrb.mxu1 %v2231_v50  ;;  %v2249_v35 = vunpack.c.h.bf16 %v1583_v22  ;;  %vm425_vm2 = vweird.f32 %v2202_v11 }
  0x9f   :  { %3020 = vst [vmem:[#allocation113_spill] sm:$0xff] %v2231_v50  ;;  %v2264_v50 = vunpack.c.l.bf16 %v1591_v62  ;;  %644 = vmatpush.msrb.mxu3 %v2257_v32 }
  0xa0   :  { %3027 = vst [vmem:[#allocation120_spill] sm:$0xff] %v2249_v35  ;;  %622 = vmatpush.msrb.mxu2 %v2233_v4  ;;  %603 = vmatpush.msrb.mxu1 %v2241_v31  ;;  %v2268_v4 = vunpack.c.l.bf16 %v1599_v19 }
  0xa1   :  { %3030 = vst [vmem:[#allocation123_spill] sm:$0xff] %v2257_v32  ;;  %584 = vmatpush.msrb.mxu0 %v2249_v35  ;;  %645 = vmatpush.msrb.mxu3 %v2270_v39  ;;  %v441_v32 = vld.sshfl [vmem:[#allocation1 + $0x8] sm:$0xff pattern:$0x73625140] }
  0xa2   :  { %3032 = vst [vmem:[#allocation125_spill] sm:$0xff] %v2264_v50  ;;  %623 = vmatpush.msrb.mxu2 %v2243_v61  ;;  %604 = vmatpush.msrb.mxu1 %v2251_v44  ;;  %v445_v44 = vld.sshfl [vmem:[#allocation1 + $0x28] sm:$0xff pattern:$0x73625140] }
  0xa3   :  { %3033 = vst [vmem:[#allocation126_spill] sm:$0xff] %v2268_v4  ;;  %585 = vmatpush.msrb.mxu0 %v2262_v45  ;;  %v443_v45 = vld.sshfl [vmem:[#allocation1 + $0x18] sm:$0xff pattern:$0x73625140] }
  0xa4   :  { %v1633_v51 = vpop.eup %1632  ;;  %624 = vmatpush.msrb.mxu2 %v2255_v12  ;;  %605 = vmatpush.msrb.mxu1 %v2264_v50  ;;  %v440_v12 = vld.sshfl [vmem:[#allocation1] sm:$0xff pattern:$0x73625140]  ;;  %v442_v50 = vld.sshfl [vmem:[#allocation1 + $0x10] sm:$0xff pattern:$0x73625140] }
  0xa5   :  { %v420_v6 = vmul.f32 %v1633_v51, %v2202_v11  ;;  %vm426_vm1 = vweird.f32 %v1633_v51  ;;  %v446_v39 = vld.sshfl [vmem:[#allocation1 + $0x30] sm:$0xff pattern:$0x73625140]  ;;  %v447_v11 = vld.sshfl [vmem:[#allocation1 + $0x38] sm:$0xff pattern:$0x73625140] }
  0xa6   :  { %625 = vmatpush.msrb.mxu2 %v2268_v4  ;;  %vm427_vm3 = vmor %vm425_vm2, %vm426_vm1  ;;  %v444_v4 = vld.sshfl [vmem:[#allocation1 + $0x20] sm:$0xff pattern:$0x73625140] }
  0xa7   :  { %v421_v54 = vmul.f32 %v1633_v51, %v420_v6 }
  0xa9   :  { %v422_v22 = vmul.f32 0.5, %v421_v54 }
  0xab   :  { %v423_v19 = vsub.f32 1.5, %v422_v22 }
  0xad   :  { %v424_v20 = vmul.f32 %v1633_v51, %v423_v19 }
  0xaf   :  { %v428_v62 = vsel %vm427_vm3, %v1633_v51, %v424_v20  ;;  %v1621_v51 = vld [vmem:[#allocation8 + $0x38] sm:$0xff]   ;;  %v1620_v20 = vld [vmem:[#allocation8 + $0x30] sm:$0xff]   ;;  %vm982_vm3 = vcmask 1045508  }
  0xb0   :  { %v429_v6 = vmul.f32 1e-06, %v428_v62 }
  0xb2   :  { %v430_v40 = vperm.slane %v429_v6, 0 }
  0xb4   :  { %v431_v54 = vmul.f32 %v430_v40, %v1864_v0  ;;  %v432_v61 = vmul.f32 %v430_v40, %v1866_v1  ;;  %v2285_v0 = vunpack.c.h.bf16 %v1621_v51 }
  0xb6   :  { %v433_v22 = vadd.f32 %v431_v54, %v1994_v27  ;;  %v434_v19 = vadd.f32 %v432_v61, %v1996_v28  ;;  %3035 = vst [vmem:[#allocation128_spill] sm:$0xff] %v2285_v0  ;;  %v1615_v28 = vld [vmem:[#allocation8 + $0x8] sm:$0xff]   ;;  %v3062_v27 = vld [vmem:[#allocation108_spill] sm:$0xff] }
  0xb8   :  { %459 = vst [vmem:[#allocation1 + $0x1] ss:$4 sm:$0xff] %v433_v22  ;;  %v2291_v22 = vunpack.c.l.bf16 %v1621_v51 }
  0xb9   :  { %461 = vst [vmem:[#allocation1 + $0x21] ss:$4 sm:$0xff] %v434_v19  ;;  %v2294_v19 = vunpack.c.h.bf16 %v1620_v20 }
  0xba   :  { %3036 = vst [vmem:[#allocation129_spill] sm:$0xff] %v2291_v22 }
  0xbb   :  { %3037 = vst [vmem:[#allocation130_spill] sm:$0xff] %v2294_v19 }
  0xbf   :  { %v462_v62 = vld.sshfl [vmem:[#allocation1] sm:$0xff pattern:$0x73625140]  ;;  %v463_v6 = vld.sshfl [vmem:[#allocation1 + $0x8] sm:$0xff pattern:$0x73625140] }
  0xc0   :  { %v479_v1 = vsel %vm478_vm4, %v440_v12, %v462_v62  ;;  %v480_v40 = vsel %vm478_vm4, %v441_v32, %v463_v6  ;;  %v464_v35 = vld.sshfl [vmem:[#allocation1 + $0x10] sm:$0xff pattern:$0x73625140]  ;;  %v465_v31 = vld.sshfl [vmem:[#allocation1 + $0x18] sm:$0xff pattern:$0x73625140] }
  0xc1   :  { %506 = vmatmul.f32.vlgmr.msra.gmra.mxu0 %v479_v1  ;;  %526 = vmatmul.f32.vlgmr.msra.gmra.mxu1 %v480_v40  ;;  %v481_v61 = vsel %vm478_vm4, %v442_v50, %v464_v35  ;;  %v482_v54 = vsel %vm478_vm4, %v443_v45, %v465_v31  ;;  %v2297_v12 = vld [vmem:[#allocation8 + $0x28] sm:$0xff]   ;;  %v466_v32 = vld.sshfl [vmem:[#allocation1 + $0x20] sm:$0xff pattern:$0x73625140]  ;;  %v2303_v45 = vunpack.c.l.bf16 %v1620_v20 }
  0xc2   :  { %546 = vmatmul.f32.vlgmr.msra.gmra.mxu2 %v481_v61  ;;  %566 = vmatmul.f32.vlgmr.msra.gmra.mxu3 %v482_v54  ;;  %v467_v35 = vld.sshfl [vmem:[#allocation1 + $0x28] sm:$0xff pattern:$0x73625140]  ;;  %v468_v31 = vld.sshfl [vmem:[#allocation1 + $0x30] sm:$0xff pattern:$0x73625140]  ;;  %v483_v51 = vsel %vm478_vm4, %v444_v4, %v466_v32  ;;  %v2313_v40 = vunpack.c.h.bf16 %v2297_v12 }
  0xc3   :  { %654 = vmatpush.msra.mxu0 %v2285_v0  ;;  %734 = vmatpush.xpose.msra.mxu1 %v2285_v0  ;;  %v469_v50 = vld.sshfl [vmem:[#allocation1 + $0x38] sm:$0xff pattern:$0x73625140]  ;;  %3038 = vst [vmem:[#allocation131_spill] sm:$0xff] %v2303_v45  ;;  %v484_v62 = vsel %vm478_vm4, %v445_v44, %v467_v35  ;;  %v485_v6 = vsel %vm478_vm4, %v446_v39, %v468_v31  ;;  %v3040_v39 = vld [vmem:[#allocation77_spill] sm:$0xff]  ;;  %v2365_v35 = vunpack.c.l.bf16 %v2297_v12 }
  0xc4   :  { %762 = vmatpush.xpose.msra.mxu2 %v1874_v5  ;;  %782 = vmatpush.xpose.msra.mxu3 %v1878_v10  ;;  %v486_v1 = vsel %vm478_vm4, %v447_v11, %v469_v50  ;;  %3039 = vst [vmem:[#allocation132_spill] sm:$0xff] %v2313_v40  ;;  %v3041_v44 = vld [vmem:[#allocation80_spill] sm:$0xff]  ;;  %v3042_v4 = vld [vmem:[#allocation81_spill] sm:$0xff] }
  0xc5   :  { %655 = vmatpush.msra.mxu0 %v2291_v22  ;;  %v3043_v11 = vld [vmem:[#allocation84_spill] sm:$0xff]  ;;  %v3044_v20 = vld [vmem:[#allocation85_spill] sm:$0xff]  ;;  %3048 = vst [vmem:[#allocation133_spill] sm:$0xff] %v2365_v35 }
  0xc6   :  { %v3045_v61 = vld [vmem:[#allocation88_spill] sm:$0xff]  ;;  %v3046_v54 = vld [vmem:[#allocation89_spill] sm:$0xff] }
  0xc7   :  { %656 = vmatpush.msra.mxu0 %v2294_v19  ;;  %735 = vmatpush.xpose.msra.mxu1 %v2291_v22  ;;  %v3047_v32 = vld [vmem:[#allocation93_spill] sm:$0xff]  ;;  %v3058_v22 = vld [vmem:[#allocation104_spill] sm:$0xff] }
  0xc8   :  { %763 = vmatpush.xpose.msra.mxu2 %v1876_v9  ;;  %783 = vmatpush.xpose.msra.mxu3 %v1884_v13  ;;  %v1618_v31 = vld [vmem:[#allocation8 + $0x20] sm:$0xff]  }
  0xc9   :  { %586 = vmatmul.f32.vlgmr.msrb.gmra.mxu0 %v483_v51  ;;  %606 = vmatmul.f32.vlgmr.msrb.gmra.mxu1 %v484_v62  ;;  %v2368_v50 = vunpack.c.h.bf16 %v1618_v31  ;;  %v2370_v51 = vunpack.c.l.bf16 %v1618_v31  ;;  %v3051_v62 = vld [vmem:[#allocation96_spill] sm:$0xff]  ;;  %v3059_v0 = vld [vmem:[#allocation105_spill] sm:$0xff] }
  0xca   :  { %626 = vmatmul.f32.vlgmr.msrb.gmra.mxu2 %v485_v6  ;;  %646 = vmatmul.f32.vlgmr.msrb.gmra.mxu3 %v486_v1  ;;  %v3052_v6 = vld [vmem:[#allocation97_spill] sm:$0xff] }
  0xcb   :  { %657 = vmatpush.msra.mxu0 %v2303_v45  ;;  %736 = vmatpush.xpose.msra.mxu1 %v2294_v19  ;;  %3049 = vst [vmem:[#allocation134_spill] sm:$0xff] %v2368_v50  ;;  %v1617_v1 = vld [vmem:[#allocation8 + $0x18] sm:$0xff]  }
  0xcc   :  { %764 = vmatpush.xpose.msra.mxu2 %v1904_v33  ;;  %784 = vmatpush.xpose.msra.mxu3 %v1906_v38  ;;  %3050 = vst [vmem:[#allocation135_spill] sm:$0xff] %v2370_v51  ;;  %v2377_v12 = vunpack.c.h.bf16 %v1617_v1  ;;  %v2383_v31 = vunpack.c.l.bf16 %v1617_v1  ;;  %v2395_v1 = vunpack.c.h.bf16 %v1615_v28 }
  0xcd   :  { %658 = vmatpush.msra.mxu0 %v2313_v40 }
  0xce   :  { %3053 = vst [vmem:[#allocation136_spill] sm:$0xff] %v2377_v12 }
  0xcf   :  { %737 = vmatpush.xpose.msra.mxu1 %v2303_v45  ;;  %659 = vmatpush.msra.mxu0 %v2365_v35  ;;  %v3055_v45 = vld [vmem:[#allocation101_spill] sm:$0xff]  ;;  %3056 = vst [vmem:[#allocation137_spill] sm:$0xff] %v2383_v31 }
  0xd0   :  { %765 = vmatpush.xpose.msra.mxu2 %v1914_v42  ;;  %785 = vmatpush.xpose.msra.mxu3 %v1916_v43  ;;  %3061 = vst [vmem:[#allocation140_spill] sm:$0xff] %v2395_v1 }
  0xd1   :  { %660 = vmatpush.msra.mxu0 %v2368_v50 }
  0xd3   :  { %738 = vmatpush.xpose.msra.mxu1 %v2313_v40  ;;  %661 = vmatpush.msra.mxu0 %v2370_v51  ;;  %v3054_v40 = vld [vmem:[#allocation100_spill] sm:$0xff] }
  0xd4   :  { %766 = vmatpush.xpose.msra.mxu2 %v1924_v47  ;;  %786 = vmatpush.xpose.msra.mxu3 %v1926_v48 }
  0xd5   :  { %662 = vmatpush.msra.mxu0 %v2377_v12 }
  0xd7   :  { %739 = vmatpush.xpose.msra.mxu1 %v2365_v35  ;;  %v1616_v35 = vld [vmem:[#allocation8 + $0x10] sm:$0xff]   ;;  %663 = vmatpush.msra.mxu0 %v2383_v31 }
  0xd8   :  { %767 = vmatpush.xpose.msra.mxu2 %v1938_v56  ;;  %787 = vmatpush.xpose.msra.mxu3 %v1940_v57  ;;  %v2386_v19 = vunpack.c.h.bf16 %v1616_v35 }
  0xda   :  { %3057 = vst [vmem:[#allocation138_spill] sm:$0xff] %v2386_v19  ;;  %664 = vmatpush.msra.mxu0 %v2386_v19 }
  0xdb   :  { %740 = vmatpush.xpose.msra.mxu1 %v2368_v50  ;;  %v2392_v50 = vunpack.c.l.bf16 %v1616_v35 }
  0xdc   :  { %768 = vmatpush.xpose.msra.mxu2 %v1951_v2  ;;  %788 = vmatpush.xpose.msra.mxu3 %v1953_v3 }
  0xdd   :  { %3060 = vst [vmem:[#allocation139_spill] sm:$0xff] %v2392_v50  ;;  %665 = vmatpush.msra.mxu0 %v2392_v50 }
  0xdf   :  { %741 = vmatpush.xpose.msra.mxu1 %v2370_v51  ;;  %666 = vmatpush.msra.mxu0 %v2395_v1  ;;  %v2401_v51 = vunpack.c.l.bf16 %v1615_v28  ;;  %v3069_v28 = vld [vmem:[#allocation18_spill] sm:$0xff] }
  0xe0   :  { %769 = vmatpush.xpose.msra.mxu2 %v1964_v15  ;;  %789 = vmatpush.xpose.msra.mxu3 %v1968_v18 }
  0xe1   :  { %3064 = vst [vmem:[#allocation141_spill] sm:$0xff] %v2401_v51  ;;  %667 = vmatpush.msra.mxu0 %v2401_v51 }
  0xe3   :  { %742 = vmatpush.xpose.msra.mxu1 %v2377_v12 }
  0xe4   :  { %770 = vmatpush.xpose.msra.mxu2 %v1976_v23  ;;  %790 = vmatpush.xpose.msra.mxu3 %v1980_v24 }
  0xe7   :  { %743 = vmatpush.xpose.msra.mxu1 %v2383_v31  ;;  %v3071_v31 = vld [vmem:[#allocation20_spill] sm:$0xff] }
  0xe8   :  { %771 = vmatpush.xpose.msra.mxu2 %v1998_v29  ;;  %791 = vmatpush.xpose.msra.mxu3 %v2000_v30 }
  0xeb   :  { %744 = vmatpush.xpose.msra.mxu1 %v2386_v19 }
  0xec   :  { %772 = vmatpush.xpose.msra.mxu2 %v2010_v46  ;;  %792 = vmatpush.xpose.msra.mxu3 %v2012_v49 }
  0xef   :  { %745 = vmatpush.xpose.msra.mxu1 %v2392_v50 }
  0xf0   :  { %773 = vmatpush.xpose.msra.mxu2 %v2022_v55  ;;  %793 = vmatpush.xpose.msra.mxu3 %v2024_v58 }
  0xf3   :  { %746 = vmatpush.xpose.msra.mxu1 %v2395_v1 }
  0xf4   :  { %774 = vmatpush.xpose.msra.mxu2 %v2034_v14  ;;  %794 = vmatpush.xpose.msra.mxu3 %v2036_v16 }
  0xf7   :  { %747 = vmatpush.xpose.msra.mxu1 %v2401_v51 }
  0xf8   :  { %775 = vmatpush.xpose.msra.mxu2 %v2046_v36  ;;  %795 = vmatpush.xpose.msra.mxu3 %v2048_v37 }
  0xfc   :  { %776 = vmatpush.xpose.msra.mxu2 %v2058_v26  ;;  %796 = vmatpush.xpose.msra.mxu3 %v2060_v63 }
 0x100   :  { %777 = vmatpush.xpose.msra.mxu2 %v2070_v21  ;;  %797 = vmatpush.xpose.msra.mxu3 %v2072_v17  ;;  %v2487_v17 = vld [vmem:[%s2705_s5] ss:$0 sm:$0xff] }
 0x101   :  { %3123 = vst [vmem:[#allocation20_spill] sm:$0xff] %v2487_v17 }
 0x104   :  { %842 = vmatpush.xpose.msrb.mxu2 %v2080_v53  ;;  %862 = vmatpush.xpose.msrb.mxu3 %v2082_v41  ;;  %v3115_v41 = vld [vmem:[#allocation98_spill] sm:$0xff] }
 0x105   :  { %v3117_v53 = vld [vmem:[#allocation106_spill] sm:$0xff] }
 0x108   :  { %843 = vmatpush.xpose.msrb.mxu2 %v2092_v60  ;;  %863 = vmatpush.xpose.msrb.mxu3 %v2094_v8  ;;  %v3110_v8 = vld [vmem:[#allocation82_spill] sm:$0xff] }
 0x109   :  { %v3112_v60 = vld [vmem:[#allocation86_spill] sm:$0xff] }
 0x10c   :  { %844 = vmatpush.xpose.msrb.mxu2 %v2104_v59  ;;  %864 = vmatpush.xpose.msrb.mxu3 %v2106_v7  ;;  %v3104_v7 = vld [vmem:[#allocation70_spill] sm:$0xff] }
 0x10d   :  { %v3106_v59 = vld [vmem:[#allocation74_spill] sm:$0xff] }
 0x110   :  { %845 = vmatpush.xpose.msrb.mxu2 %v2116_v34  ;;  %865 = vmatpush.xpose.msrb.mxu3 %v3040_v39  ;;  %v3098_v39 = vld [vmem:[#allocation39_spill] sm:$0xff] }
 0x111   :  { %v3100_v34 = vld [vmem:[#allocation43_spill] sm:$0xff] }
 0x114   :  { %846 = vmatpush.xpose.msrb.mxu2 %v3041_v44  ;;  %866 = vmatpush.xpose.msrb.mxu3 %v3042_v4  ;;  %v3095_v4 = vld [vmem:[#allocation50_spill] sm:$0xff] }
 0x115   :  { %v3097_v44 = vld [vmem:[#allocation54_spill] sm:$0xff] }
 0x118   :  { %847 = vmatpush.xpose.msrb.mxu2 %v3043_v11  ;;  %867 = vmatpush.xpose.msrb.mxu3 %v3044_v20  ;;  %v3083_v11 = vld [vmem:[#allocation30_spill] sm:$0xff] }
 0x11c   :  { %848 = vmatpush.xpose.msrb.mxu2 %v3045_v61  ;;  %868 = vmatpush.xpose.msrb.mxu3 %v3046_v54 }
 0x120   :  { %849 = vmatpush.xpose.msrb.mxu2 %v2164_v25  ;;  %869 = vmatpush.xpose.msrb.mxu3 %v3047_v32  ;;  %v3079_v25 = vld [vmem:[#allocation26_spill] sm:$0xff] }
 0x124   :  { %850 = vmatpush.xpose.msrb.mxu2 %v3051_v62  ;;  %870 = vmatpush.xpose.msrb.mxu3 %v3052_v6 }
 0x128   :  { %851 = vmatpush.xpose.msrb.mxu2 %v3054_v40  ;;  %871 = vmatpush.xpose.msrb.mxu3 %v3055_v45  ;;  %v3063_v45 = vld [vmem:[#allocation109_spill] sm:$0xff] }
 0x129   :  { %v3067_v40 = vld [vmem:[#allocation113_spill] sm:$0xff] }
 0x12c   :  { %852 = vmatpush.xpose.msrb.mxu2 %v3058_v22  ;;  %872 = vmatpush.xpose.msrb.mxu3 %v3059_v0  ;;  %v1521_v0 = vld [vmem:[#allocation8] sm:$0xff]   ;;  %v3066_v22 = vld [vmem:[#allocation112_spill] sm:$0xff] }
 0x12d   :  { %v2404_v35 = vunpack.c.h.bf16 %v1521_v0  ;;  %v2410_v12 = vunpack.c.l.bf16 %v1521_v0  ;;  %v2424_v0 = vld [vmem:[%s2703_s3] ss:$0 sm:$0xff] }
 0x12e   :  { %3074 = vst [vmem:[#allocation18_spill] sm:$0xff] %v2424_v0 }
 0x12f   :  { %3065 = vst [vmem:[#allocation142_spill] sm:$0xff] %v2404_v35  ;;  %668 = vmatpush.msra.mxu0 %v2404_v35  ;;  %748 = vmatpush.xpose.msra.mxu1 %v2404_v35  ;;  %v3094_v35 = vld [vmem:[#allocation33_spill] sm:$0xff] }
 0x130   :  { %853 = vmatpush.xpose.msrb.mxu2 %v3062_v27  ;;  %873 = vmatpush.xpose.msrb.mxu3 %v3063_v45  ;;  %3068 = vst [vmem:[#allocation143_spill] sm:$0xff] %v2410_v12  ;;  %v3070_v45 = vld [vmem:[#allocation117_spill] sm:$0xff]  ;;  %v3075_v27 = vld [vmem:[#allocation22_spill] sm:$0xff] }
 0x131   :  { %669 = vmatpush.msra.mxu0 %v2410_v12 }
 0x133   :  { %802 = vmatpush.xpose.msrb.mxu0 %v3069_v28  ;;  %749 = vmatpush.xpose.msra.mxu1 %v2410_v12  ;;  %v3093_v12 = vld [vmem:[#allocation46_spill] sm:$0xff] }
 0x134   :  { %854 = vmatpush.xpose.msrb.mxu2 %v3066_v22  ;;  %874 = vmatpush.xpose.msrb.mxu3 %v3067_v40  ;;  %v3072_v22 = vld [vmem:[#allocation120_spill] sm:$0xff]  ;;  %v3073_v40 = vld [vmem:[#allocation121_spill] sm:$0xff] }
 0x137   :  { %803 = vmatpush.xpose.msrb.mxu0 %v3071_v31 }
 0x138   :  { %855 = vmatpush.xpose.msrb.mxu2 %v2239_v52  ;;  %875 = vmatpush.xpose.msrb.mxu3 %v3070_v45  ;;  %v3076_v52 = vld [vmem:[#allocation124_spill] sm:$0xff]  ;;  %v3077_v45 = vld [vmem:[#allocation125_spill] sm:$0xff] }
 0x13b   :  { %804 = vmatpush.xpose.msrb.mxu0 %v3075_v27 }
 0x13c   :  { %856 = vmatpush.xpose.msrb.mxu2 %v3072_v22  ;;  %876 = vmatpush.xpose.msrb.mxu3 %v3073_v40  ;;  %v3078_v40 = vld [vmem:[#allocation24_spill] sm:$0xff] }
 0x13e   :  { %v507_v19 = vpop.f32.mrf.mxu0  ;;  %v527_v6 = vpop.f32.mrf.mxu1 }
 0x13f   :  { %v508_v50 = vadd.f32 %v2424_v0, %v507_v19  ;;  %805 = vmatpush.xpose.msrb.mxu0 %v3078_v40  ;;  %v3081_v19 = vld [vmem:[#allocation28_spill] sm:$0xff] }
 0x140   :  { %857 = vmatpush.xpose.msrb.mxu2 %v3076_v52  ;;  %877 = vmatpush.xpose.msrb.mxu3 %v3077_v45  ;;  %v3080_v52 = vld [vmem:[#allocation19_spill] sm:$0xff] }
 0x141   :  { %v528_v22 = vadd.f32 %v527_v6, %v508_v50  ;;  %822 = vmatpush.xpose.msrb.mxu1 %v3080_v52  ;;  %v3082_v6 = vld [vmem:[#allocation21_spill] sm:$0xff]  ;;  %v3121_v52 = vld [vmem:[#allocation122_spill] sm:$0xff] }
 0x143   :  { %806 = vmatpush.xpose.msrb.mxu0 %v3079_v25 }
 0x145   :  { %v547_v62 = vpop.f32.mrf.mxu2  ;;  %v567_v32 = vpop.f32.mrf.mxu3  ;;  %823 = vmatpush.xpose.msrb.mxu1 %v3082_v6  ;;  %v3113_v6 = vld [vmem:[#allocation90_spill] sm:$0xff] }
 0x146   :  { %v548_v1 = vadd.f32 %v547_v62, %v528_v22  ;;  %v587_v61 = vpop.f32.mrf.mxu0  ;;  %v607_v0 = vpop.f32.mrf.mxu1 }
 0x147   :  { %807 = vmatpush.xpose.msrb.mxu0 %v3081_v19 }
 0x148   :  { %v568_v54 = vadd.f32 %v567_v32, %v548_v1  ;;  %v3084_v1 = vld [vmem:[#allocation23_spill] sm:$0xff] }
 0x149   :  { %824 = vmatpush.xpose.msrb.mxu1 %v3084_v1  ;;  %v3108_v1 = vld [vmem:[#allocation78_spill] sm:$0xff] }
 0x14a   :  { %v588_v45 = vadd.f32 %v587_v61, %v568_v54  ;;  %v3085_v61 = vld [vmem:[#allocation32_spill] sm:$0xff]  ;;  %v3086_v54 = vld [vmem:[#allocation25_spill] sm:$0xff] }
 0x14b   :  { %808 = vmatpush.xpose.msrb.mxu0 %v3083_v11 }
 0x14c   :  { %v608_v51 = vadd.f32 %v607_v0, %v588_v45  ;;  %v3087_v45 = vld [vmem:[#allocation34_spill] sm:$0xff]  ;;  %v3090_v0 = vld [vmem:[#allocation29_spill] sm:$0xff] }
 0x14d   :  { %v627_v20 = vpop.f32.mrf.mxu2  ;;  %v647_v22 = vpop.f32.mrf.mxu3  ;;  %825 = vmatpush.xpose.msrb.mxu1 %v3086_v54  ;;  %v3102_v54 = vld [vmem:[#allocation66_spill] sm:$0xff] }
 0x14e   :  { %v628_v50 = vadd.f32 %v627_v20, %v608_v51  ;;  %v3088_v20 = vld [vmem:[#allocation27_spill] sm:$0xff]  ;;  %v3089_v51 = vld [vmem:[#allocation38_spill] sm:$0xff] }
 0x14f   :  { %809 = vmatpush.xpose.msrb.mxu0 %v3085_v61 }
 0x150   :  { %v2440_v62 = vadd.f32 %v647_v22, %v628_v50  ;;  %v3091_v50 = vld [vmem:[#allocation42_spill] sm:$0xff]  ;;  %v3092_v22 = vld [vmem:[#allocation31_spill] sm:$0xff] }
 0x151   :  { %826 = vmatpush.xpose.msrb.mxu1 %v3088_v20  ;;  %v3099_v20 = vld [vmem:[#allocation58_spill] sm:$0xff] }
 0x152   :  { %v2903_v32 = vmax.f32 %v2440_v62, 0.0 }
 0x153   :  { %810 = vmatpush.xpose.msrb.mxu0 %v3087_v45 }
 0x154   :  { %670 = vmatmul.f32.vlgmr.msra.gmra.mxu0 %v2903_v32  ;;  %v3096_v32 = vld [vmem:[#allocation35_spill] sm:$0xff] }
 0x155   :  { %827 = vmatpush.xpose.msrb.mxu1 %v3090_v0  ;;  %v3101_v0 = vld [vmem:[#allocation62_spill] sm:$0xff] }
 0x157   :  { %811 = vmatpush.xpose.msrb.mxu0 %v3089_v51 }
 0x159   :  { %828 = vmatpush.xpose.msrb.mxu1 %v3092_v22  ;;  %v3103_v22 = vld [vmem:[#allocation47_spill] sm:$0xff] }
 0x15b   :  { %812 = vmatpush.xpose.msrb.mxu0 %v3091_v50 }
 0x15d   :  { %829 = vmatpush.xpose.msrb.mxu1 %v3094_v35  ;;  %v3105_v35 = vld [vmem:[#allocation51_spill] sm:$0xff] }
 0x15f   :  { %813 = vmatpush.xpose.msrb.mxu0 %v3093_v12 }
 0x161   :  { %830 = vmatpush.xpose.msrb.mxu1 %v3096_v32  ;;  %v3107_v32 = vld [vmem:[#allocation55_spill] sm:$0xff] }
 0x163   :  { %814 = vmatpush.xpose.msrb.mxu0 %v3095_v4 }
 0x165   :  { %831 = vmatpush.xpose.msrb.mxu1 %v3098_v39  ;;  %v3109_v39 = vld [vmem:[#allocation59_spill] sm:$0xff] }
 0x167   :  { %815 = vmatpush.xpose.msrb.mxu0 %v3097_v44 }
 0x169   :  { %832 = vmatpush.xpose.msrb.mxu1 %v3100_v34  ;;  %v3111_v34 = vld [vmem:[#allocation63_spill] sm:$0xff] }
 0x16b   :  { %816 = vmatpush.xpose.msrb.mxu0 %v3099_v20 }
 0x16d   :  { %833 = vmatpush.xpose.msrb.mxu1 %v3103_v22  ;;  %v3114_v22 = vld [vmem:[#allocation94_spill] sm:$0xff] }
 0x16f   :  { %817 = vmatpush.xpose.msrb.mxu0 %v3101_v0  ;;  %v3119_v0 = vld [vmem:[#allocation114_spill] sm:$0xff] }
 0x171   :  { %834 = vmatpush.xpose.msrb.mxu1 %v3105_v35  ;;  %v3116_v35 = vld [vmem:[#allocation102_spill] sm:$0xff] }
 0x173   :  { %882 = vmatpush.xpose.msra.mxu0 %v3102_v54 }
 0x175   :  { %835 = vmatpush.xpose.msrb.mxu1 %v3107_v32  ;;  %v3118_v32 = vld [vmem:[#allocation110_spill] sm:$0xff] }
 0x177   :  { %883 = vmatpush.xpose.msra.mxu0 %v3104_v7 }
 0x179   :  { %836 = vmatpush.xpose.msrb.mxu1 %v3109_v39  ;;  %v3120_v39 = vld [vmem:[#allocation118_spill] sm:$0xff] }
 0x17b   :  { %884 = vmatpush.xpose.msra.mxu0 %v3106_v59 }
 0x17d   :  { %837 = vmatpush.xpose.msrb.mxu1 %v3111_v34  ;;  %v3122_v34 = vld [vmem:[#allocation126_spill] sm:$0xff] }
 0x17f   :  { %885 = vmatpush.xpose.msra.mxu0 %v3108_v1 }
 0x183   :  { %886 = vmatpush.xpose.msra.mxu0 %v3110_v8 }
 0x187   :  { %887 = vmatpush.xpose.msra.mxu0 %v3112_v60 }
 0x18b   :  { %888 = vmatpush.xpose.msra.mxu0 %v3113_v6 }
 0x18f   :  { %889 = vmatpush.xpose.msra.mxu0 %v3114_v22 }
 0x193   :  { %890 = vmatpush.xpose.msra.mxu0 %v3115_v41 }
 0x197   :  { %891 = vmatpush.xpose.msra.mxu0 %v3116_v35 }
 0x19b   :  { %892 = vmatpush.xpose.msra.mxu0 %v3117_v53 }
 0x19f   :  { %893 = vmatpush.xpose.msra.mxu0 %v3118_v32 }
 0x1a3   :  { %894 = vmatpush.xpose.msra.mxu0 %v3119_v0 }
 0x1a7   :  { %895 = vmatpush.xpose.msra.mxu0 %v3120_v39 }
 0x1ab   :  { %896 = vmatpush.xpose.msra.mxu0 %v3121_v52 }
 0x1af   :  { %897 = vmatpush.xpose.msra.mxu0 %v3122_v34 }
 0x1d1   :  { %v671_v21 = vpop.f32.mrf.mxu0 }
 0x1d2   :  { %v672_v20 = vadd.f32 %v2487_v17, %v671_v21 }
 0x1d4   :  { %1228 = vst [vmem:[#allocation10] sm:$0x3] %v672_v20  ;;  %v702_v63 = vsel %vm701_vm5, %v672_v20, -inf  ;;  %v674_v26 = vsel %vm478_vm4, %v672_v20, -inf }
 0x1d5   :  { %703 = vmax.xlane.f32.xlu1 %v702_v63  ;;  %675 = vmax.xlane.f32.xlu0 %v674_v26  ;;  %1239 = dma.vmem_to_hbm [thread:$0]  %s1235_s25, 32, %s1237_s23, [#allocation4]  }
 0x248   :  { %v704_v39 = vpop.xlane.xlu1 %703  ;;  %v676_v52 = vpop.xlane.xlu0 %675 }
 0x249   :  { %v705_v44 = vsub.f32 %v672_v20, %v704_v39  ;;  %v2492_v34 = vsub.f32 %v672_v20, %v676_v52 }
 0x24b   :  { %3124 = vst [vmem:[#allocation22_spill] sm:$0xff] %v2492_v34  ;;  %v706_v37 = vmul.f32 1.442695, %v705_v44  ;;  %v678_v36 = vmul.f32 1.442695, %v2492_v34 }
 0x24d   :  { %1634 = vpow2.f32 %v706_v37 }
 0x24e   :  { %1636 = vpow2.f32 %v678_v36 }
 0x253   :  { %v1635_v0 = vpop.eup %1634 }
 0x254   :  { %v1637_v4 = vpop.eup %1636  ;;  %v708_v21 = vsel %vm701_vm5, %v1635_v0, 0.0 }
 0x255   :  { %709 = vadd.xlane.f32.xlu2 %v708_v21  ;;  %v680_v17 = vsel %vm478_vm4, %v1637_v4, 0.0 }
 0x256   :  { %681 = vadd.xlane.f32.xlu1 %v680_v17 }
 0x2c8   :  { %v710_v63 = vpop.xlane.xlu2 %709 }
 0x2c9   :  { %1638 = vrcp.f32 %v710_v63  ;;  %v2497_v26 = vpop.xlane.xlu1 %681  ;;  %v722_v16 = vand.u32 2147483648, %v710_v63  ;;  %v720_v14 = vand.u32 2147483647, %v710_v63  ;;  %vm716_vm8 = vweird.f32 %v710_v63 }
 0x2ca   :  { %1640 = vrcp.f32 %v2497_v26  ;;  %v694_v21 = vand.u32 2147483648, %v2497_v26  ;;  %v692_v32 = vand.u32 2147483647, %v2497_v26  ;;  %vm688_vm10 = vweird.f32 %v2497_v26 }
 0x2cb   :  { %v723_v53 = vor.u32 1.1754944e-38, %v722_v16  ;;  %vm721_vm12 = vcmp.eq.f32.partialorder %v720_v14, 8.507059e+37  ;;  %v3127_v16 = vld [vmem:[#allocation75_spill] sm:$0xff] }
 0x2cc   :  { %vm693_vm13 = vcmp.eq.f32.partialorder %v692_v32, 8.507059e+37  ;;  %v3128_v14 = vld [vmem:[#allocation79_spill] sm:$0xff] }
 0x2cd   :  { %v3134_v32 = vld [vmem:[#allocation103_spill] sm:$0xff] }
 0x2cf   :  { %v1639_v52 = vpop.eup %1638 }
 0x2d0   :  { %v1641_v39 = vpop.eup %1640  ;;  %v712_v44 = vmul.f32 %v1639_v52, %v710_v63  ;;  %vm717_vm6 = vweird.f32 %v1639_v52 }
 0x2d1   :  { %v684_v37 = vmul.f32 %v1641_v39, %v2497_v26  ;;  %vm689_vm7 = vweird.f32 %v1641_v39  ;;  %vm718_vm9 = vmor %vm716_vm8, %vm717_vm6  ;;  %vm1226_vm6 = vcmask 0  }
 0x2d2   :  { %v713_v36 = vsub.f32 1.0, %v712_v44  ;;  %vm690_vm11 = vmor %vm688_vm10, %vm689_vm7  ;;  %v695_v44 = vor.u32 1.1754944e-38, %v694_v21  ;;  %v3140_v21 = vld [vmem:[#allocation127_spill] sm:$0xff] }
 0x2d3   :  { %v685_v20 = vsub.f32 1.0, %v684_v37 }
 0x2d4   :  { %v714_v34 = vmul.f32 %v1639_v52, %v713_v36 }
 0x2d5   :  { %v686_v17 = vmul.f32 %v1641_v39, %v685_v20 }
 0x2d6   :  { %v715_v12 = vadd.f32 %v1639_v52, %v714_v34 }
 0x2d7   :  { %v687_v58 = vadd.f32 %v1641_v39, %v686_v17  ;;  %v3125_v17 = vld [vmem:[#allocation67_spill] sm:$0xff] }
 0x2d8   :  { %v719_v55 = vsel %vm718_vm9, %v1639_v52, %v715_v12  ;;  %v3126_v12 = vld [vmem:[#allocation71_spill] sm:$0xff] }
 0x2d9   :  { %v691_v37 = vsel %vm690_vm11, %v1641_v39, %v687_v58  ;;  %v724_v36 = vsel %vm721_vm12, %v723_v53, %v719_v55  ;;  %v3129_v58 = vld [vmem:[#allocation83_spill] sm:$0xff] }
 0x2da   :  { %v696_v50 = vsel %vm693_vm13, %v695_v44, %v691_v37  ;;  %v725_v20 = vmul.f32 %v1635_v0, %v724_v36  ;;  %v3130_v55 = vld [vmem:[#allocation87_spill] sm:$0xff]  ;;  %v3141_v36 = vmax.f32 %v2440_v62, 0.0  ;;  %v3175_v62 = vld [vmem:[#allocation73_spill] sm:$0xff] }
 0x2db   :  { %v2504_v49 = vmul.f32 %v1637_v4, %v696_v50  ;;  %v3131_v53 = vld [vmem:[#allocation91_spill] sm:$0xff] }
 0x2dc   :  { %v3132_v4 = vld [vmem:[#allocation95_spill] sm:$0xff]  ;;  %vm754_vm14 = vcmp.gt.f32.partialorder %v3141_v36, 0.0 }
 0x2dd   :  { %v727_v46 = vrot.slane %v2504_v49, 6  ;;  %v3136_v0 = vld [vmem:[#allocation111_spill] sm:$0xff] }
 0x2de   :  { %v3137_v50 = vld [vmem:[#allocation115_spill] sm:$0xff] }
 0x2df   :  { %v729_v34 = vsub.f32 %v725_v20, %v727_v46  ;;  %v3133_v46 = vld [vmem:[#allocation99_spill] sm:$0xff] }
 0x2e0   :  { %v3138_v52 = vld [vmem:[#allocation119_spill] sm:$0xff] }
 0x2e1   :  { %v730_v63 = vmul.f32 0.5, %v729_v34  ;;  %v3139_v39 = vld [vmem:[#allocation123_spill] sm:$0xff] }
 0x2e2   :  { %v3185_v36 = vld [vmem:[#allocation31_spill] sm:$0xff] }
 0x2e3   :  { %v732_v35 = vrot.slane %v730_v63, 2  ;;  %v3182_v63 = vld [vmem:[#allocation29_spill] sm:$0xff] }
 0x2e5   :  { %750 = vmatmul.f32.vlgmr.msra.gmra.mxu1 %v732_v35  ;;  %v3135_v35 = vld [vmem:[#allocation107_spill] sm:$0xff] }
 0x2e6   :  { %902 = vmatpush.xpose.msra.mxu1 %v3125_v17 }
 0x2ea   :  { %903 = vmatpush.xpose.msra.mxu1 %v3126_v12 }
 0x2ee   :  { %904 = vmatpush.xpose.msra.mxu1 %v3127_v16 }
 0x2f2   :  { %905 = vmatpush.xpose.msra.mxu1 %v3128_v14 }
 0x2f6   :  { %906 = vmatpush.xpose.msra.mxu1 %v3129_v58 }
 0x2fa   :  { %907 = vmatpush.xpose.msra.mxu1 %v3130_v55 }
 0x2fe   :  { %908 = vmatpush.xpose.msra.mxu1 %v3131_v53 }
 0x302   :  { %909 = vmatpush.xpose.msra.mxu1 %v3132_v4 }
 0x306   :  { %910 = vmatpush.xpose.msra.mxu1 %v3133_v46 }
 0x30a   :  { %911 = vmatpush.xpose.msra.mxu1 %v3134_v32 }
 0x30e   :  { %912 = vmatpush.xpose.msra.mxu1 %v3135_v35 }
 0x312   :  { %913 = vmatpush.xpose.msra.mxu1 %v3136_v0 }
 0x316   :  { %914 = vmatpush.xpose.msra.mxu1 %v3137_v50 }
 0x31a   :  { %915 = vmatpush.xpose.msra.mxu1 %v3138_v52 }
 0x31e   :  { %916 = vmatpush.xpose.msra.mxu1 %v3139_v39 }
 0x322   :  { %917 = vmatpush.xpose.msra.mxu1 %v3140_v21 }
 0x362   :  { %v751_v44 = vpop.f32.mrf.mxu1 }
 0x363   :  { %v756_v37 = vrot.slane %v751_v44, 6  ;;  %v3183_v44 = vld [vmem:[#allocation84_spill] sm:$0xff] }
 0x365   :  { %v758_v20 = vsel %vm754_vm14, %v756_v37, 0.0  ;;  %v3184_v37 = vld [vmem:[#allocation85_spill] sm:$0xff] }
 0x366   :  { %v760_v34 = vrot.slane %v758_v20, 2  ;;  %v3186_v20 = vld [vmem:[#allocation88_spill] sm:$0xff] }
 0x368   :  { %778 = vmatmul.f32.vlgmr.msra.gmra.mxu2 %v760_v34  ;;  %798 = vmatmul.f32.vlgmr.msra.gmra.mxu3 %v760_v34 }
 0x369   :  { %818 = vmatmul.f32.vlgmr.msrb.gmra.mxu0 %v760_v34  ;;  %838 = vmatmul.f32.vlgmr.msrb.gmra.mxu1 %v760_v34 }
 0x36a   :  { %1014 = vmatpush.msra.mxu2 %v1874_v5  ;;  %1034 = vmatpush.msra.mxu3 %v1878_v10  ;;  %v3142_v5 = vld [vmem:[#allocation102_spill] sm:$0xff]  ;;  %v3144_v10 = vld [vmem:[#allocation41_spill] sm:$0xff] }
 0x36b   :  { %1054 = vmatpush.msrb.mxu0 %v3069_v28  ;;  %1134 = vmatpush.msrb.mxu1 %v3102_v54  ;;  %v3172_v28 = vld [vmem:[#allocation69_spill] sm:$0xff] }
 0x36c   :  { %1015 = vmatpush.msra.mxu2 %v1876_v9  ;;  %1035 = vmatpush.msra.mxu3 %v1884_v13  ;;  %v3143_v9 = vld [vmem:[#allocation40_spill] sm:$0xff]  ;;  %v3145_v13 = vld [vmem:[#allocation42_spill] sm:$0xff]  ;;  %v3178_v54 = vld [vmem:[#allocation77_spill] sm:$0xff] }
 0x36d   :  { %1055 = vmatpush.msrb.mxu0 %v3071_v31  ;;  %1135 = vmatpush.msrb.mxu1 %v3104_v7  ;;  %v3167_v7 = vld [vmem:[#allocation64_spill] sm:$0xff] }
 0x36e   :  { %1016 = vmatpush.msra.mxu2 %v1904_v33  ;;  %1036 = vmatpush.msra.mxu3 %v1906_v38  ;;  %v3146_v33 = vld [vmem:[#allocation106_spill] sm:$0xff]  ;;  %v3147_v38 = vld [vmem:[#allocation44_spill] sm:$0xff] }
 0x36f   :  { %1056 = vmatpush.msrb.mxu0 %v3075_v27  ;;  %1136 = vmatpush.msrb.mxu1 %v3106_v59  ;;  %v3160_v27 = vld [vmem:[#allocation57_spill] sm:$0xff]  ;;  %v3163_v59 = vld [vmem:[#allocation60_spill] sm:$0xff] }
 0x370   :  { %858 = vmatmul.f32.vlgmr.msrb.gmra.mxu2 %v760_v34  ;;  %878 = vmatmul.f32.vlgmr.msrb.gmra.mxu3 %v760_v34  ;;  %v3171_v31 = vld [vmem:[#allocation68_spill] sm:$0xff] }
 0x371   :  { %898 = vmatmul.f32.vlgmr.msra.gmra.mxu0 %v760_v34  ;;  %918 = vmatmul.f32.vlgmr.msra.gmra.mxu1 %v760_v34  ;;  %v3187_v34 = vld [vmem:[#allocation89_spill] sm:$0xff] }
 0x372   :  { %1017 = vmatpush.msra.mxu2 %v1914_v42  ;;  %1037 = vmatpush.msra.mxu3 %v1916_v43  ;;  %v3148_v42 = vld [vmem:[#allocation45_spill] sm:$0xff]  ;;  %v3149_v43 = vld [vmem:[#allocation46_spill] sm:$0xff] }
 0x373   :  { %1057 = vmatpush.msrb.mxu0 %v3078_v40  ;;  %1137 = vmatpush.msrb.mxu1 %v3108_v1  ;;  %v3169_v40 = vld [vmem:[#allocation21_spill] sm:$0xff] }
 0x374   :  { %1018 = vmatpush.msra.mxu2 %v1924_v47  ;;  %1038 = vmatpush.msra.mxu3 %v1926_v48  ;;  %v3150_v47 = vld [vmem:[#allocation110_spill] sm:$0xff]  ;;  %v3151_v48 = vld [vmem:[#allocation48_spill] sm:$0xff]  ;;  %v3176_v1 = vld [vmem:[#allocation25_spill] sm:$0xff] }
 0x375   :  { %1058 = vmatpush.msrb.mxu0 %v3079_v25  ;;  %1138 = vmatpush.msrb.mxu1 %v3110_v8  ;;  %v3166_v8 = vld [vmem:[#allocation62_spill] sm:$0xff]  ;;  %v3168_v25 = vld [vmem:[#allocation65_spill] sm:$0xff] }
 0x376   :  { %1019 = vmatpush.msra.mxu2 %v1938_v56  ;;  %1039 = vmatpush.msra.mxu3 %v1940_v57  ;;  %v3152_v56 = vld [vmem:[#allocation49_spill] sm:$0xff]  ;;  %v3153_v57 = vld [vmem:[#allocation50_spill] sm:$0xff] }
 0x377   :  { %1059 = vmatpush.msrb.mxu0 %v3081_v19  ;;  %1139 = vmatpush.msrb.mxu1 %v3112_v60  ;;  %v3165_v60 = vld [vmem:[#allocation19_spill] sm:$0xff] }
 0x378   :  { %1020 = vmatpush.msra.mxu2 %v1951_v2  ;;  %1040 = vmatpush.msra.mxu3 %v1953_v3  ;;  %v3154_v2 = vld [vmem:[#allocation114_spill] sm:$0xff]  ;;  %v3155_v3 = vld [vmem:[#allocation52_spill] sm:$0xff]  ;;  %v3173_v19 = vld [vmem:[#allocation23_spill] sm:$0xff] }
 0x379   :  { %1060 = vmatpush.msrb.mxu0 %v3083_v11  ;;  %1140 = vmatpush.msrb.mxu1 %v3113_v6  ;;  %v3170_v11 = vld [vmem:[#allocation126_spill] sm:$0xff]  ;;  %v3174_v6 = vld [vmem:[#allocation72_spill] sm:$0xff] }
 0x37a   :  { %1021 = vmatpush.msra.mxu2 %v1964_v15  ;;  %1041 = vmatpush.msra.mxu3 %v1968_v18  ;;  %v3156_v15 = vld [vmem:[#allocation53_spill] sm:$0xff]  ;;  %v3157_v18 = vld [vmem:[#allocation54_spill] sm:$0xff] }
 0x37b   :  { %1061 = vmatpush.msrb.mxu0 %v3085_v61  ;;  %1141 = vmatpush.msrb.mxu1 %v3114_v22  ;;  %v3177_v61 = vld [vmem:[#allocation76_spill] sm:$0xff]  ;;  %v3181_v22 = vld [vmem:[#allocation81_spill] sm:$0xff] }
 0x37c   :  { %1022 = vmatpush.msra.mxu2 %v1976_v23  ;;  %1042 = vmatpush.msra.mxu3 %v1980_v24  ;;  %v3158_v23 = vld [vmem:[#allocation118_spill] sm:$0xff]  ;;  %v3159_v24 = vld [vmem:[#allocation56_spill] sm:$0xff] }
 0x37d   :  { %1062 = vmatpush.msrb.mxu0 %v3087_v45  ;;  %1142 = vmatpush.msrb.mxu1 %v3115_v41  ;;  %v3164_v41 = vld [vmem:[#allocation61_spill] sm:$0xff]  ;;  %v3179_v45 = vld [vmem:[#allocation27_spill] sm:$0xff] }
 0x37e   :  { %1023 = vmatpush.msra.mxu2 %v1998_v29  ;;  %1043 = vmatpush.msra.mxu3 %v2000_v30  ;;  %v3161_v29 = vld [vmem:[#allocation58_spill] sm:$0xff] }
 0x37f   :  { %1063 = vmatpush.msrb.mxu0 %v3089_v51  ;;  %1143 = vmatpush.msrb.mxu1 %v3142_v5  ;;  %v3162_v30 = vld [vmem:[#allocation122_spill] sm:$0xff]  ;;  %v3180_v51 = vld [vmem:[#allocation80_spill] sm:$0xff]  ;;  %v3188_v5 = vld [vmem:[#allocation33_spill] sm:$0xff] }
 0x380   :  { %1024 = vmatpush.msra.mxu2 %v3143_v9  ;;  %1044 = vmatpush.msra.mxu3 %v3144_v10  ;;  %v3189_v9 = vld [vmem:[#allocation92_spill] sm:$0xff]  ;;  %v3190_v10 = vld [vmem:[#allocation93_spill] sm:$0xff] }
 0x381   :  { %1064 = vmatpush.msrb.mxu0 %v3145_v13  ;;  %1144 = vmatpush.msrb.mxu1 %v3146_v33  ;;  %v3191_v13 = vld [vmem:[#allocation35_spill] sm:$0xff]  ;;  %v3192_v33 = vld [vmem:[#allocation96_spill] sm:$0xff] }
 0x382   :  { %1025 = vmatpush.msra.mxu2 %v3147_v38  ;;  %1045 = vmatpush.msra.mxu3 %v3148_v42  ;;  %v3193_v38 = vld [vmem:[#allocation97_spill] sm:$0xff]  ;;  %v3194_v42 = vld [vmem:[#allocation39_spill] sm:$0xff] }
 0x383   :  { %1065 = vmatpush.msrb.mxu0 %v3149_v43  ;;  %1145 = vmatpush.msrb.mxu1 %v3150_v47  ;;  %v3195_v43 = vld [vmem:[#allocation100_spill] sm:$0xff]  ;;  %v3196_v47 = vld [vmem:[#allocation101_spill] sm:$0xff] }
 0x384   :  { %1026 = vmatpush.msra.mxu2 %v3151_v48  ;;  %1046 = vmatpush.msra.mxu3 %v3152_v56  ;;  %v3197_v48 = vld [vmem:[#allocation43_spill] sm:$0xff]  ;;  %v3198_v56 = vld [vmem:[#allocation104_spill] sm:$0xff] }
 0x385   :  { %1066 = vmatpush.msrb.mxu0 %v3153_v57  ;;  %1146 = vmatpush.msrb.mxu1 %v3154_v2  ;;  %v3199_v57 = vld [vmem:[#allocation105_spill] sm:$0xff]  ;;  %v3200_v2 = vld [vmem:[#allocation47_spill] sm:$0xff] }
 0x386   :  { %1027 = vmatpush.msra.mxu2 %v3155_v3  ;;  %1047 = vmatpush.msra.mxu3 %v3156_v15  ;;  %v3201_v3 = vld [vmem:[#allocation108_spill] sm:$0xff]  ;;  %v3202_v15 = vld [vmem:[#allocation109_spill] sm:$0xff] }
 0x387   :  { %1067 = vmatpush.msrb.mxu0 %v3157_v18  ;;  %1147 = vmatpush.msrb.mxu1 %v3158_v23  ;;  %v3203_v18 = vld [vmem:[#allocation51_spill] sm:$0xff]  ;;  %v3204_v23 = vld [vmem:[#allocation112_spill] sm:$0xff] }
 0x388   :  { %1028 = vmatpush.msra.mxu2 %v3159_v24  ;;  %1048 = vmatpush.msra.mxu3 %v3160_v27  ;;  %v3205_v24 = vld [vmem:[#allocation113_spill] sm:$0xff]  ;;  %v3206_v27 = vld [vmem:[#allocation55_spill] sm:$0xff] }
 0x389   :  { %1068 = vmatpush.msrb.mxu0 %v3161_v29  ;;  %1148 = vmatpush.msrb.mxu1 %v3162_v30  ;;  %v3207_v29 = vld [vmem:[#allocation116_spill] sm:$0xff]  ;;  %v3208_v30 = vld [vmem:[#allocation117_spill] sm:$0xff] }
 0x38a   :  { %1029 = vmatpush.msra.mxu2 %v3163_v59  ;;  %1049 = vmatpush.msra.mxu3 %v3164_v41  ;;  %v3209_v59 = vld [vmem:[#allocation59_spill] sm:$0xff]  ;;  %v3210_v41 = vld [vmem:[#allocation120_spill] sm:$0xff] }
 0x38b   :  { %1069 = vmatpush.msrb.mxu0 %v3166_v8  ;;  %1149 = vmatpush.msrb.mxu1 %v3170_v11  ;;  %v3212_v8 = vld [vmem:[#allocation63_spill] sm:$0xff] }
 0x38c   :  { %1074 = vmatpush.msrb.mxu2 %v3165_v60  ;;  %1094 = vmatpush.msrb.mxu3 %v3167_v7  ;;  %v3211_v60 = vld [vmem:[#allocation121_spill] sm:$0xff]  ;;  %v3213_v7 = vld [vmem:[#allocation124_spill] sm:$0xff] }
 0x38d   :  { %1114 = vmatpush.msra.mxu0 %v3168_v25  ;;  %v3214_v25 = vld [vmem:[#allocation125_spill] sm:$0xff] }
 0x38e   :  { %1075 = vmatpush.msrb.mxu2 %v3169_v40  ;;  %1095 = vmatpush.msrb.mxu3 %v3171_v31 }
 0x38f   :  { %1115 = vmatpush.msra.mxu0 %v3172_v28 }
 0x390   :  { %1076 = vmatpush.msrb.mxu2 %v3173_v19  ;;  %1096 = vmatpush.msrb.mxu3 %v3174_v6 }
 0x391   :  { %1116 = vmatpush.msra.mxu0 %v3175_v62 }
 0x392   :  { %1077 = vmatpush.msrb.mxu2 %v3176_v1  ;;  %1097 = vmatpush.msrb.mxu3 %v3177_v61 }
 0x393   :  { %1117 = vmatpush.msra.mxu0 %v3178_v54 }
 0x394   :  { %1078 = vmatpush.msrb.mxu2 %v3179_v45  ;;  %1098 = vmatpush.msrb.mxu3 %v3180_v51 }
 0x395   :  { %1118 = vmatpush.msra.mxu0 %v3181_v22 }
 0x396   :  { %1079 = vmatpush.msrb.mxu2 %v3182_v63  ;;  %1099 = vmatpush.msrb.mxu3 %v3183_v44 }
 0x397   :  { %1119 = vmatpush.msra.mxu0 %v3184_v37 }
 0x398   :  { %1080 = vmatpush.msrb.mxu2 %v3185_v36  ;;  %1100 = vmatpush.msrb.mxu3 %v3186_v20 }
 0x399   :  { %1120 = vmatpush.msra.mxu0 %v3187_v34 }
 0x39a   :  { %1081 = vmatpush.msrb.mxu2 %v3188_v5  ;;  %1101 = vmatpush.msrb.mxu3 %v3189_v9 }
 0x39b   :  { %1121 = vmatpush.msra.mxu0 %v3190_v10 }
 0x39c   :  { %1082 = vmatpush.msrb.mxu2 %v3191_v13  ;;  %1102 = vmatpush.msrb.mxu3 %v3192_v33 }
 0x39d   :  { %1122 = vmatpush.msra.mxu0 %v3193_v38 }
 0x39e   :  { %1083 = vmatpush.msrb.mxu2 %v3194_v42  ;;  %1103 = vmatpush.msrb.mxu3 %v3195_v43 }
 0x39f   :  { %1123 = vmatpush.msra.mxu0 %v3196_v47 }
 0x3a0   :  { %1084 = vmatpush.msrb.mxu2 %v3197_v48  ;;  %1104 = vmatpush.msrb.mxu3 %v3198_v56 }
 0x3a1   :  { %1124 = vmatpush.msra.mxu0 %v3199_v57 }
 0x3a2   :  { %1085 = vmatpush.msrb.mxu2 %v3200_v2  ;;  %1105 = vmatpush.msrb.mxu3 %v3201_v3 }
 0x3a3   :  { %1125 = vmatpush.msra.mxu0 %v3202_v15 }
 0x3a4   :  { %1086 = vmatpush.msrb.mxu2 %v3203_v18  ;;  %1106 = vmatpush.msrb.mxu3 %v3204_v23 }
 0x3a5   :  { %1126 = vmatpush.msra.mxu0 %v3205_v24 }
 0x3a6   :  { %1087 = vmatpush.msrb.mxu2 %v3206_v27  ;;  %1107 = vmatpush.msrb.mxu3 %v3207_v29 }
 0x3a7   :  { %1127 = vmatpush.msra.mxu0 %v3208_v30 }
 0x3a8   :  { %1088 = vmatpush.msrb.mxu2 %v3209_v59  ;;  %1108 = vmatpush.msrb.mxu3 %v3210_v41 }
 0x3a9   :  { %1128 = vmatpush.msra.mxu0 %v3211_v60 }
 0x3aa   :  { %1089 = vmatpush.msrb.mxu2 %v3212_v8  ;;  %1109 = vmatpush.msrb.mxu3 %v3213_v7 }
 0x3ab   :  { %1129 = vmatpush.msra.mxu0 %v3214_v25 }
 0x3e6   :  { %v819_v40 = vpop.f32.mrf.mxu0  ;;  %v839_v11 = vpop.f32.mrf.mxu1 }
 0x3e7   :  { %v924_v19 = vmul.f32 %v819_v40, %v819_v40  ;;  %v925_v51 = vmul.f32 %v839_v11, %v839_v11 }
 0x3e9   :  { %v933_v45 = vsel %vm400_vm0, %v924_v19, 0.0  ;;  %v935_v36 = vsel %vm400_vm0, %v925_v51, 0.0 }
 0x3eb   :  { %v779_v31 = vpop.f32.mrf.mxu2  ;;  %v799_v28 = vpop.f32.mrf.mxu3 }
 0x3ec   :  { %v922_v6 = vmul.f32 %v779_v31, %v779_v31  ;;  %v923_v62 = vmul.f32 %v799_v28, %v799_v28 }
 0x3ee   :  { %v930_v1 = vsel %vm400_vm0, %v922_v6, 0.0  ;;  %v931_v61 = vsel %vm400_vm0, %v923_v62, 0.0  ;;  %v899_v63 = vpop.f32.mrf.mxu0  ;;  %v919_v5 = vpop.f32.mrf.mxu1 }
 0x3ef   :  { %v932_v54 = vadd.f32 %v931_v61, %v930_v1  ;;  %v928_v10 = vmul.f32 %v899_v63, %v899_v63  ;;  %v929_v38 = vmul.f32 %v919_v5, %v919_v5 }
 0x3f1   :  { %v934_v22 = vadd.f32 %v933_v45, %v932_v54  ;;  %v941_v47 = vsel %vm400_vm0, %v928_v10, 0.0  ;;  %v943_v56 = vsel %vm400_vm0, %v929_v38, 0.0  ;;  %v3218_v38 = vld [vmem:[#allocation129_spill] sm:$0xff] }
 0x3f3   :  { %v859_v44 = vpop.f32.mrf.mxu2  ;;  %v879_v37 = vpop.f32.mrf.mxu3  ;;  %v936_v9 = vadd.f32 %v935_v36, %v934_v22 }
 0x3f4   :  { %v926_v20 = vmul.f32 %v859_v44, %v859_v44  ;;  %v927_v34 = vmul.f32 %v879_v37, %v879_v37 }
 0x3f6   :  { %v937_v13 = vsel %vm400_vm0, %v926_v20, 0.0  ;;  %v939_v42 = vsel %vm400_vm0, %v927_v34, 0.0  ;;  %vm984_vm0 = vcmask 1043456   ;;  %v3216_v34 = vld [vmem:[#allocation37_spill] sm:$0xff] }
 0x3f7   :  { %v938_v33 = vadd.f32 %v937_v13, %v936_v9 }
 0x3f9   :  { %v940_v43 = vadd.f32 %v939_v42, %v938_v33  ;;  %v3217_v33 = vld [vmem:[#allocation128_spill] sm:$0xff]  ;;  %v3219_v42 = vld [vmem:[#allocation130_spill] sm:$0xff] }
 0x3fb   :  { %v942_v48 = vadd.f32 %v941_v47, %v940_v43 }
 0x3fd   :  { %v944_v57 = vadd.f32 %v943_v56, %v942_v48  ;;  %v3224_v56 = vld [vmem:[#allocation135_spill] sm:$0xff] }
 0x3ff   :  { %945 = vadd.xlane.f32.xlu2 %v944_v57  ;;  %v3231_v57 = vld [vmem:[#allocation142_spill] sm:$0xff] }
 0x472   :  { %v946_v2 = vpop.xlane.xlu2 %945 }
 0x473   :  { %v947_v3 = vmax.f32 %v946_v2, 1e-12 }
 0x475   :  { %1642 = vrsqrt.f32 %v947_v3  ;;  %vm954_vm1 = vweird.f32 %v947_v3 }
 0x47b   :  { %v1643_v15 = vpop.eup %1642 }
 0x47c   :  { %v949_v18 = vmul.f32 %v1643_v15, %v947_v3  ;;  %vm955_vm15 = vweird.f32 %v1643_v15 }
 0x47d   :  { %vm956_vm2 = vmor %vm954_vm1, %vm955_vm15 }
 0x47e   :  { %v950_v23 = vmul.f32 %v1643_v15, %v949_v18 }
 0x480   :  { %v951_v24 = vmul.f32 0.5, %v950_v23 }
 0x482   :  { %v952_v27 = vsub.f32 1.5, %v951_v24 }
 0x484   :  { %v953_v29 = vmul.f32 %v1643_v15, %v952_v27 }
 0x486   :  { %v957_v30 = vsel %vm956_vm2, %v1643_v15, %v953_v29 }
 0x487   :  { %v958_v59 = vperm.slane %v957_v30, 0 }
 0x489   :  { %v960_v41 = vmul.f32 %v958_v59, %v799_v28  ;;  %v961_v60 = vmul.f32 %v958_v59, %v819_v40  ;;  %v962_v8 = vmul.f32 %v958_v59, %v839_v11  ;;  %v964_v7 = vmul.f32 %v958_v59, %v879_v37 }
 0x48a   :  { %v965_v25 = vmul.f32 %v958_v59, %v899_v63  ;;  %v966_v19 = vmul.f32 %v958_v59, %v919_v5  ;;  %v959_v6 = vmul.f32 %v958_v59, %v779_v31  ;;  %v963_v54 = vmul.f32 %v958_v59, %v859_v44  ;;  %v3215_v31 = vld [vmem:[#allocation36_spill] sm:$0xff] }
 0x48b   :  { %v975_v62 = vrot.slane %v960_v41, 6  ;;  %v976_v1 = vrot.slane %v961_v60, 4  ;;  %v977_v61 = vrot.slane %v962_v8, 2  ;;  %v978_v45 = vrot.slane %v964_v7, 6 }
 0x48c   :  { %v979_v51 = vrot.slane %v965_v25, 4  ;;  %v980_v22 = vrot.slane %v966_v19, 2  ;;  %v3234_v19 = vld [vmem:[#allocation20_spill] sm:$0xff] }
 0x48d   :  { %v981_v36 = vsel %vm478_vm4, %v959_v6, %v975_v62  ;;  %v983_v20 = vsel %vm982_vm3, %v976_v1, %v977_v61  ;;  %v986_v40 = vsel %vm478_vm4, %v963_v54, %v978_v45 }
 0x48e   :  { %v985_v28 = vsel %vm984_vm0, %v981_v36, %v983_v20  ;;  %v987_v11 = vsel %vm982_vm3, %v979_v51, %v980_v22  ;;  %v1207_v20 = vlaneseq }
 0x48f   :  { %v988_v63 = vsel %vm984_vm0, %v986_v40, %v987_v11  ;;  %v991_v37 = vadd.f32 %v985_v28, %v3215_v31 }
 0x490   :  { %v992_v5 = vadd.f32 %v988_v63, %v3216_v34  ;;  %v1208_v63 = vand.u32 127, %v1207_v20 }
 0x491   :  { %995 = vst [vmem:[#allocation1] ss:$4 sm:$0xff] %v991_v37  ;;  %v3235_v37 = vld [vmem:[#allocation22_spill] sm:$0xff] }
 0x492   :  { %997 = vst [vmem:[#allocation1 + $0x20] ss:$4 sm:$0xff] %v992_v5  ;;  %vm1209_vm5 = vcmp.lt.s32.totalorder %v1208_v63, 16 }
 0x498   :  { %v998_v44 = vld.sshfl [vmem:[#allocation1] sm:$0xff pattern:$0x73625140]  ;;  %v999_v9 = vld.sshfl [vmem:[#allocation1 + $0x8] sm:$0xff pattern:$0x73625140] }
 0x499   :  { %1030 = vmatmul.f32.vlgmr.msra.gmra.mxu2 %v998_v44  ;;  %1050 = vmatmul.f32.vlgmr.msra.gmra.mxu3 %v999_v9  ;;  %v1000_v10 = vld.sshfl [vmem:[#allocation1 + $0x10] sm:$0xff pattern:$0x73625140]  ;;  %v1002_v43 = vld.sshfl [vmem:[#allocation1 + $0x20] sm:$0xff pattern:$0x73625140] }
 0x49a   :  { %v1004_v13 = vld.sshfl [vmem:[#allocation1 + $0x30] sm:$0xff pattern:$0x73625140]  ;;  %1070 = vmatmul.f32.vlgmr.msrb.gmra.mxu0 %v1000_v10  ;;  %1154 = vmatpush.msra.mxu2 %v3125_v17  ;;  %v1001_v47 = vld.sshfl [vmem:[#allocation1 + $0x18] sm:$0xff pattern:$0x73625140] }
 0x49b   :  { %1150 = vmatmul.f32.vlgmr.msrb.gmra.mxu1 %v1004_v13  ;;  %1175 = vmatpush.msra.mxu3 %v3217_v33  ;;  %v1003_v48 = vld.sshfl [vmem:[#allocation1 + $0x28] sm:$0xff pattern:$0x73625140]  ;;  %v3220_v17 = vld [vmem:[#allocation131_spill] sm:$0xff] }
 0x49c   :  { %1155 = vmatpush.msra.mxu2 %v3126_v12  ;;  %v3221_v12 = vld [vmem:[#allocation132_spill] sm:$0xff] }
 0x49d   :  { %1176 = vmatpush.msra.mxu3 %v3218_v38 }
 0x49e   :  { %1156 = vmatpush.msra.mxu2 %v3127_v16  ;;  %v3222_v16 = vld [vmem:[#allocation133_spill] sm:$0xff] }
 0x49f   :  { %1177 = vmatpush.msra.mxu3 %v3219_v42 }
 0x4a0   :  { %1157 = vmatpush.msra.mxu2 %v3128_v14  ;;  %v3223_v14 = vld [vmem:[#allocation134_spill] sm:$0xff] }
 0x4a1   :  { %1110 = vmatmul.f32.vlgmr.msrb.gmra.mxu3 %v1002_v43  ;;  %1090 = vmatmul.f32.vlgmr.msrb.gmra.mxu2 %v1001_v47 }
 0x4a2   :  { %1130 = vmatmul.f32.vlgmr.msra.gmra.mxu0 %v1003_v48  ;;  %1158 = vmatpush.msra.mxu2 %v3129_v58  ;;  %v3225_v58 = vld [vmem:[#allocation136_spill] sm:$0xff] }
 0x4a3   :  { %1178 = vmatpush.msra.mxu3 %v3220_v17 }
 0x4a4   :  { %1159 = vmatpush.msra.mxu2 %v3130_v55  ;;  %v3226_v55 = vld [vmem:[#allocation137_spill] sm:$0xff] }
 0x4a5   :  { %1179 = vmatpush.msra.mxu3 %v3221_v12 }
 0x4a6   :  { %1160 = vmatpush.msra.mxu2 %v3131_v53  ;;  %v3227_v53 = vld [vmem:[#allocation138_spill] sm:$0xff] }
 0x4a7   :  { %1180 = vmatpush.msra.mxu3 %v3222_v16 }
 0x4a8   :  { %1161 = vmatpush.msra.mxu2 %v3132_v4  ;;  %v3228_v4 = vld [vmem:[#allocation139_spill] sm:$0xff] }
 0x4a9   :  { %1181 = vmatpush.msra.mxu3 %v3223_v14 }
 0x4aa   :  { %1162 = vmatpush.msra.mxu2 %v3133_v46  ;;  %v3229_v46 = vld [vmem:[#allocation140_spill] sm:$0xff] }
 0x4ab   :  { %1182 = vmatpush.msra.mxu3 %v3224_v56 }
 0x4ac   :  { %1163 = vmatpush.msra.mxu2 %v3134_v32  ;;  %v3230_v32 = vld [vmem:[#allocation141_spill] sm:$0xff] }
 0x4ad   :  { %1183 = vmatpush.msra.mxu3 %v3225_v58 }
 0x4ae   :  { %1164 = vmatpush.msra.mxu2 %v3135_v35  ;;  %v1005_v35 = vld.sshfl [vmem:[#allocation1 + $0x38] sm:$0xff pattern:$0x73625140] }
 0x4af   :  { %1184 = vmatpush.msra.mxu3 %v3226_v55 }
 0x4b0   :  { %1165 = vmatpush.msra.mxu2 %v3136_v0  ;;  %v3232_v0 = vld [vmem:[#allocation143_spill] sm:$0xff] }
 0x4b1   :  { %1185 = vmatpush.msra.mxu3 %v3227_v53 }
 0x4b2   :  { %1166 = vmatpush.msra.mxu2 %v3137_v50  ;;  %v3233_v50 = vld [vmem:[#allocation18_spill] sm:$0xff] }
 0x4b3   :  { %1186 = vmatpush.msra.mxu3 %v3228_v4 }
 0x4b4   :  { %1167 = vmatpush.msra.mxu2 %v3138_v52 }
 0x4b5   :  { %1187 = vmatpush.msra.mxu3 %v3229_v46 }
 0x4b6   :  { %1168 = vmatpush.msra.mxu2 %v3139_v39 }
 0x4b7   :  { %1188 = vmatpush.msra.mxu3 %v3230_v32 }
 0x4b8   :  { %1169 = vmatpush.msra.mxu2 %v3140_v21 }
 0x4b9   :  { %1189 = vmatpush.msra.mxu3 %v3231_v57  ;;  %1170 = vmatmul.f32.vlgmr.msra.gmra.mxu2 %v1005_v35 }
 0x4bb   :  { %1190 = vmatpush.msra.mxu3 %v3232_v0 }
 0x517   :  { %v1071_v52 = vpop.f32.mrf.mxu0 }
 0x518   :  { %v1151_v21 = vpop.f32.mrf.mxu1 }
 0x51c   :  { %v1031_v2 = vpop.f32.mrf.mxu2  ;;  %v1051_v15 = vpop.f32.mrf.mxu3 }
 0x51d   :  { %v1032_v3 = vadd.f32 %v3233_v50, %v1031_v2 }
 0x51f   :  { %v1052_v18 = vadd.f32 %v1051_v15, %v1032_v3  ;;  %v1131_v30 = vpop.f32.mrf.mxu0 }
 0x521   :  { %v1072_v24 = vadd.f32 %v1071_v52, %v1052_v18 }
 0x524   :  { %v1091_v23 = vpop.f32.mrf.mxu2  ;;  %v1111_v39 = vpop.f32.mrf.mxu3 }
 0x525   :  { %v1092_v27 = vadd.f32 %v1091_v23, %v1072_v24 }
 0x527   :  { %v1112_v29 = vadd.f32 %v1111_v39, %v1092_v27 }
 0x529   :  { %v1132_v59 = vadd.f32 %v1131_v30, %v1112_v29 }
 0x52b   :  { %v1152_v41 = vadd.f32 %v1151_v21, %v1132_v59 }
 0x53c   :  { %v1171_v60 = vpop.f32.mrf.mxu2 }
 0x53d   :  { %v1172_v8 = vadd.f32 %v1171_v60, %v1152_v41 }
 0x53f   :  { %v1174_v7 = vmax.f32 %v1172_v8, 0.0 }
 0x541   :  { %1191 = vmatmul.f32.vlgmr.msra.gmra.mxu3 %v1174_v7 }
 0x5c4   :  { %v1192_v25 = vpop.f32.mrf.mxu3 }
 0x5c5   :  { %v1193_v6 = vadd.f32 %v3234_v19, %v1192_v25 }
 0x5c7   :  { %v1195_v62 = vsel %vm478_vm4, %v1193_v6, -inf }
 0x5c8   :  { %1196 = vmax.xlane.f32.xlu0 %v1195_v62 }
 0x63b   :  { %v1197_v1 = vpop.xlane.xlu0 %1196 }
 0x63c   :  { %v1198_v61 = vsub.f32 %v1193_v6, %v1197_v1 }
 0x63e   :  { %v1199_v54 = vmul.f32 1.442695, %v1198_v61 }
 0x640   :  { %1644 = vpow2.f32 %v1199_v54 }
 0x641   :  { %1646 = vlog2.f32 %v2497_v26 }
 0x646   :  { %v1645_v45 = vpop.eup %1644 }
 0x647   :  { %v1201_v51 = vsel %vm478_vm4, %v1645_v45, 0.0  ;;  %v1647_v36 = vpop.eup %1646 }
 0x648   :  { %1202 = vadd.xlane.f32.xlu1 %v1201_v51  ;;  %v699_v28 = vmul.f32 0.6931472, %v1647_v36 }
 0x64a   :  { %v700_v34 = vsub.f32 %v3235_v37, %v699_v28 }
 0x6bb   :  { %v1203_v22 = vpop.xlane.xlu1 %1202 }
 0x6bc   :  { %1648 = vlog2.f32 %v1203_v22 }
 0x6c2   :  { %v1649_v40 = vpop.eup %1648 }
 0x6c3   :  { %v1205_v11 = vmul.f32 0.6931472, %v1649_v40 }
 0x6c5   :  { %v1206_v31 = vsub.f32 %v1198_v61, %v1205_v11 }
 0x6c7   :  { %v1210_v5 = vsub.f32 %v700_v34, %v1206_v31 }
 0x6c9   :  { %v1211_v44 = vmul.f32 %v1210_v5, %v2504_v49 }
 0x6cb   :  { %v1214_v9 = vsel %vm1209_vm5, %v1211_v44, 0.0 }
 0x6cc   :  { %v1215_v10 = vsel %vm478_vm4, %v1214_v9, 0.0 }
 0x6cd   :  { %1216 = vadd.xlane.f32.xlu2 %v1215_v10 }
 0x740   :  { %v1217_v26 = vpop.xlane.xlu2 %1216 }
 0x741   :  { %v1218_v13 = vsel %vm478_vm4, %v1217_v26, 0.0 }
 0x742   :  { %v1219_v33 = vrot.slane %v1218_v13, 4 }
 0x744   :  { %v1220_v38 = vadd.f32 %v1219_v33, %v1218_v13 }
 0x746   :  { %v1221_v42 = vrot.slane %v1220_v38, 2 }
 0x748   :  { %v1222_v49 = vadd.f32 %v1221_v42, %v1220_v38 }
 0x74a   :  { %v1223_v43 = vrot.slane %v1222_v49, 1 }
 0x74c   :  { %v1224_v47 = vadd.f32 %v1223_v43, %v1222_v49 }
 0x74e   :  { %v1225_v48 = vmul.f32 0.5, %v1224_v47 }
 0x750   :  { %1227 = vst.msk [vmem:[#allocation11] sm:$0x1] %vm1226_vm6, %v1225_v48 }
 0x751   :  { %1250 = dma.vmem_to_hbm [thread:$0]  %s1246_s27, 16, %s1248_s30, [#allocation12]  }
 0x752   :  { %1800 = dma.done.wait [#allocation4], 32  }
 0x753   :  { %1801 = vsyncadd [#allocation4], 4294967264 }
 0x754   :  { %1802 = dma.done.wait [#allocation12], 16  }
 0x755   :  { %1803 = vsyncadd [#allocation12], 4294967280 }
 0x756   :  { %1259 = vsyncpa [#allocation3], 1 }
 0x757   :  { %1260 = vsyncpa [#allocation6], 1 }
 0x758   :  { %1261 = vsyncpa [#allocation9], 1 }
 0x759   :  { %1262 = vsyncpa [#allocation4], 1 }
 0x75a   :  { %1263 = vsyncpa [#allocation12], 1 }

</bundles_post_ra>
